<compile_context>
chip_gen: v6e
topology: v6e:2x2x1
jax: 0.10.0
libtpu: 0.0.40
codegen_flags: <defaults>
</compile_context>

<pallas_src>
import jax
import jax.numpy as jnp
from jax.experimental import pallas as pl
from jax.experimental.pallas import tpu as pltpu

BN_EPS = 1e-5


def _mlp_kernel(x_ref, w1_ref, g1_ref, bt1_ref, w2_ref, g2_ref, bt2_ref,
                wo_ref, bo_ref,                      # inputs
                out_ref,                             # output
                h1_buf, h2_buf, s1_ref, ss1_ref, s2_ref, ss2_ref):  # scratch
    """3-phase fused MLP forward.

    phase 0: h1 = x_tile @ W1, stash pre-BN activations, accumulate sum / sumsq.
    phase 1: BN1 + ReLU on stashed h1, h2 = a1 @ W2, stash, accumulate layer-2 stats.
    phase 2: BN2 + ReLU, output = sum(a2 * wo, lanes) + bo, lane-dense (1, TB) store.
    """
    phase = pl.program_id(0)
    i = pl.program_id(1)
    n_tiles = pl.num_programs(1)
    tb = x_ref.shape[0]
    inv_b = 1.0 / h1_buf.shape[0]                    # 1 / full batch size (static)
    rows = pl.ds(pl.multiple_of(i * tb, tb), tb)     # this tile's rows in the scratch buffers

    # ---------------- phase 0: Linear 1 (bias cancelled by BN) + stats ----------------
    @pl.when(phase == 0)
    def _phase0():
        @pl.when(i == 0)
        def _init():
            s1_ref[...] = jnp.zeros_like(s1_ref)
            ss1_ref[...] = jnp.zeros_like(ss1_ref)

        h1 = jnp.dot(x_ref[...], w1_ref[...], preferred_element_type=jnp.float32)
        h1_buf[rows, :] = h1
        s1_ref[...] += jnp.sum(h1, axis=0, keepdims=True)
        ss1_ref[...] += jnp.sum(h1 * h1, axis=0, keepdims=True)

        @pl.when(i == n_tiles - 1)
        def _finalize():
            mean = s1_ref[...] * inv_b
            var = ss1_ref[...] * inv_b - mean * mean
            s1_ref[...] = mean                              # reuse as: mean
            ss1_ref[...] = jax.lax.rsqrt(var + BN_EPS)      # reuse as: inv-std

    # ---------------- phase 1: BN1 + ReLU, Linear 2 + stats ----------------
    @pl.when(phase == 1)
    def _phase1():
        @pl.when(i == 0)
        def _init():
            s2_ref[...] = jnp.zeros_like(s2_ref)
            ss2_ref[...] = jnp.zeros_like(ss2_ref)

        h1 = h1_buf[rows, :]
        a1 = jnp.maximum(
            (h1 - s1_ref[...]) * ss1_ref[...] * g1_ref[...] + bt1_ref[...], 0.0)
        h2 = jnp.dot(a1.astype(w2_ref.dtype), w2_ref[...],
                     preferred_element_type=jnp.float32)
        h2_buf[rows, :] = h2
        s2_ref[...] += jnp.sum(h2, axis=0, keepdims=True)
        ss2_ref[...] += jnp.sum(h2 * h2, axis=0, keepdims=True)

        @pl.when(i == n_tiles - 1)
        def _finalize():
            mean = s2_ref[...] * inv_b
            var = ss2_ref[...] * inv_b - mean * mean
            s2_ref[...] = mean
            ss2_ref[...] = jax.lax.rsqrt(var + BN_EPS)

    # ---------------- phase 2: BN2 + ReLU, output Linear as VPU reduce ----------------
    @pl.when(phase == 2)
    def _phase2():
        h2 = h2_buf[rows, :]
        a2 = jnp.maximum(
            (h2 - s2_ref[...]) * ss2_ref[...] * g2_ref[...] + bt2_ref[...], 0.0)
        # 1-wide output column -> elementwise multiply + lane reduce (keeps MXU free).
        o = jnp.sum(a2 * wo_ref[...], axis=-1) + bo_ref[0]
        out_ref[...] = o.reshape(1, tb)                     # lane-dense (1, TB) store


def mlp_forward(x, params, *, tb=128):
    (w1, b1, g1, bt1, w2, b2, g2, bt2, wo, bo) = params
    del b1, b2  # hidden-layer Linear biases cancel exactly under training-mode BatchNorm
    B, d_in = x.shape
    h1 = w1.shape[1]
    h2 = w2.shape[1]
    assert B % tb == 0, "batch must be a multiple of the batch tile"
    n_tiles = B // tb

    # bf16 matmul inputs (MXU fast path on v6e/v7x); all elementwise math stays f32.
    x_bf = x.astype(jnp.bfloat16)
    w1_bf = w1.astype(jnp.bfloat16)
    w2_bf = w2.astype(jnp.bfloat16)
    wo_row = wo.reshape(1, h2).astype(jnp.float32)   # output weights as a (1, H2) row
    bo_s = bo.reshape(1).astype(jnp.float32)         # scalar output bias -> SMEM

    const2 = lambda p, i: (0, 0)                     # weights stay VMEM-resident

    grid_spec = pltpu.PrefetchScalarGridSpec(
        num_scalar_prefetch=0,
        grid=(3, n_tiles),                           # (phase, batch tile)
        in_specs=[
            pl.BlockSpec((tb, d_in), lambda p, i: (i, 0)),   # x: streamed batch tiles
            pl.BlockSpec((d_in, h1), const2),                # W1
            pl.BlockSpec((1, h1), const2),                   # gamma1
            pl.BlockSpec((1, h1), const2),                   # beta1
            pl.BlockSpec((h1, h2), const2),                  # W2
            pl.BlockSpec((1, h2), const2),                   # gamma2
            pl.BlockSpec((1, h2), const2),                   # beta2
            pl.BlockSpec((1, h2), const2),                   # wo (row form)
            pl.BlockSpec(memory_space=pltpu.SMEM),           # bo scalar
        ],
        out_specs=pl.BlockSpec((1, tb), lambda p, i: (0, i)),  # lane-dense output tiles
        scratch_shapes=[
            pltpu.VMEM((B, h1), jnp.float32),  # pre-BN layer-1 activations
            pltpu.VMEM((B, h2), jnp.float32),  # pre-BN layer-2 activations
            pltpu.VMEM((1, h1), jnp.float32),  # layer-1 sum   -> mean
            pltpu.VMEM((1, h1), jnp.float32),  # layer-1 sumsq -> inv-std
            pltpu.VMEM((1, h2), jnp.float32),  # layer-2 sum   -> mean
            pltpu.VMEM((1, h2), jnp.float32),  # layer-2 sumsq -> inv-std
        ],
    )

    out = pl.pallas_call(
        _mlp_kernel,
        out_shape=jax.ShapeDtypeStruct((1, B), jnp.float32),
        grid_spec=grid_spec,
        compiler_params=pltpu.CompilerParams(
            # batch-tile axis carries the BN reduction -> must stay "arbitrary"
            dimension_semantics=("arbitrary", "arbitrary"),
            vmem_limit_bytes=32 * 1024 * 1024,   # fits v7x's 64 MiB physical VMEM comfortably
        ),
    )(x_bf, w1_bf, g1, bt1, w2_bf, g2, bt2, wo_row, bo_s)

    return out.reshape(B, 1)


def init_params(key, input_dim, embed_dims):
    """torch.nn.Linear-style init (uniform +/- 1/sqrt(fan_in)); BN gamma/beta randomized
    so the affine part is actually exercised. Weights stored (in, out) -> kernel does x @ W."""
    params = []
    d_in = input_dim
    for h in embed_dims:
        key, kw, kb, kg, kbt = jax.random.split(key, 5)
        bound = 1.0 / jnp.sqrt(d_in)
        w = jax.random.uniform(kw, (d_in, h), jnp.float32, -bound, bound)
        b = jax.random.uniform(kb, (1, h), jnp.float32, -bound, bound)
        gamma = jax.random.uniform(kg, (1, h), jnp.float32, 0.5, 1.5)
        beta = 0.1 * jax.random.normal(kbt, (1, h), jnp.float32)
        params += [w, b, gamma, beta]
        d_in = h
    key, kw, kb = jax.random.split(key, 3)
    bound = 1.0 / jnp.sqrt(d_in)
    wo = jax.random.uniform(kw, (d_in, 1), jnp.float32, -bound, bound)
    bo = jax.random.uniform(kb, (1, 1), jnp.float32, -bound, bound)
    params += [wo, bo]
    return tuple(params)


def mlp_reference(x, params):
    """Pure-JAX reference with the module's exact structure (Linear biases included,
    centered-variance BN). Matmul inputs are cast to bf16 to mirror the kernel's dtype choice."""
    (w1, b1, g1, bt1, w2, b2, g2, bt2, wo, bo) = params

    def bn_relu(h, g, bt):
        mean = jnp.mean(h, axis=0, keepdims=True)
        var = jnp.mean((h - mean) ** 2, axis=0, keepdims=True)
        return jnp.maximum((h - mean) * jax.lax.rsqrt(var + BN_EPS) * g + bt, 0.0)

    h = jnp.dot(x.astype(jnp.bfloat16), w1.astype(jnp.bfloat16),
                preferred_element_type=jnp.float32) + b1
    a = bn_relu(h, g1, bt1)
    h = jnp.dot(a.astype(jnp.bfloat16), w2.astype(jnp.bfloat16),
                preferred_element_type=jnp.float32) + b2
    a = bn_relu(h, g2, bt2)
    return a @ wo + bo


if __name__ == "__main__":
    input_dim = 64
    embed_dims = (128, 128)   # lane-aligned hidden widths
    batch = 512               # 4 batch tiles of 128

    key = jax.random.PRNGKey(0)
    key, kx = jax.random.split(key)
    x = jax.random.normal(kx, (batch, input_dim), jnp.float32)
    params = init_params(key, input_dim, embed_dims)

    out = jax.block_until_ready(mlp_forward(x, params))
    ref = mlp_reference(x, params)

    assert out.shape == (batch, 1)
    assert jnp.allclose(out, ref, atol=2e-2, rtol=2e-2), (
        float(jnp.max(jnp.abs(out - ref))))
    print("KERNEL_OK")
</pallas_src>

<mosaic_0001>
module attributes {stable_mosaic.version = 11 : i64} {
  func.func @_mlp_kernel(%arg0: i32, %arg1: i32, %arg2: memref<128x64xbf16, #tpu.memory_space<vmem>>, %arg3: memref<64x128xbf16, #tpu.memory_space<vmem>>, %arg4: memref<1x128xf32, #tpu.memory_space<vmem>>, %arg5: memref<1x128xf32, #tpu.memory_space<vmem>>, %arg6: memref<128x128xbf16, #tpu.memory_space<vmem>>, %arg7: memref<1x128xf32, #tpu.memory_space<vmem>>, %arg8: memref<1x128xf32, #tpu.memory_space<vmem>>, %arg9: memref<1x128xf32, #tpu.memory_space<vmem>>, %arg10: memref<1xf32, #tpu.memory_space<smem>>, %arg11: memref<1x128xf32, #tpu.memory_space<vmem>>, %arg12: memref<512x128xf32, #tpu.memory_space<vmem>>, %arg13: memref<512x128xf32, #tpu.memory_space<vmem>>, %arg14: memref<1x128xf32, #tpu.memory_space<vmem>>, %arg15: memref<1x128xf32, #tpu.memory_space<vmem>>, %arg16: memref<1x128xf32, #tpu.memory_space<vmem>>, %arg17: memref<1x128xf32, #tpu.memory_space<vmem>>) attributes {dimension_semantics = [#tpu.dimension_semantics<arbitrary>, #tpu.dimension_semantics<arbitrary>], iteration_bounds = array<i64: 3, 4>, scalar_prefetch = 0 : i64, scratch_operands = 6 : i64, tpu.core_type = #tpu.core_type<tc>, window_params = [{transform_indices = @transform_0, window_bounds = array<i64: 128, 64>}, {pipeline_mode = #tpu.pipeline_mode<synchronous>, transform_indices = @transform_1, window_bounds = array<i64: 64, 128>}, {pipeline_mode = #tpu.pipeline_mode<synchronous>, transform_indices = @transform_2, window_bounds = array<i64: 1, 128>}, {pipeline_mode = #tpu.pipeline_mode<synchronous>, transform_indices = @transform_3, window_bounds = array<i64: 1, 128>}, {pipeline_mode = #tpu.pipeline_mode<synchronous>, transform_indices = @transform_4, window_bounds = array<i64: 128, 128>}, {pipeline_mode = #tpu.pipeline_mode<synchronous>, transform_indices = @transform_5, window_bounds = array<i64: 1, 128>}, {pipeline_mode = #tpu.pipeline_mode<synchronous>, transform_indices = @transform_6, window_bounds = array<i64: 1, 128>}, {pipeline_mode = #tpu.pipeline_mode<synchronous>, transform_indices = @transform_7, window_bounds = array<i64: 1, 128>}, {transform_indices = @transform_8, window_bounds = array<i64: 1>}, {transform_indices = @transform_9, window_bounds = array<i64: 1, 128>}]} {
    %c128_i32 = arith.constant 128 : i32
    %0 = arith.muli %arg1, %c128_i32 : i32
    %1 = tpu.assume_multiple %0, 128 : i32
    %c0_i32 = arith.constant 0 : i32
    %2 = arith.cmpi eq, %arg0, %c0_i32 : i32
    %3 = arith.extui %2 : i1 to i32
    %c0_i32_0 = arith.constant 0 : i32
    %4 = arith.cmpi ne, %3, %c0_i32_0 : i32
    scf.if %4 {
      %c0_i32_3 = arith.constant 0 : i32
      %11 = arith.cmpi eq, %arg1, %c0_i32_3 : i32
      %12 = arith.extui %11 : i1 to i32
      %c0_i32_4 = arith.constant 0 : i32
      %13 = arith.cmpi ne, %12, %c0_i32_4 : i32
      scf.if %13 {
        %cst_20 = arith.constant 0.000000e+00 : f32
        %33 = vector.broadcast %cst_20 : f32 to vector<1x128xf32>
        %c0_21 = arith.constant 0 : index
        %c0_22 = arith.constant 0 : index
        %34 = vector.load %arg14[%c0_21, %c0_22] : memref<1x128xf32, #tpu.memory_space<vmem>>, vector<1x128xf32>
        tpu.vector_store %arg14[%c0_21, %c0_22], %33 {strides = array<i32>} : memref<1x128xf32, #tpu.memory_space<vmem>>, vector<1x128xf32>,
        %cst_23 = arith.constant 0.000000e+00 : f32
        %35 = vector.broadcast %cst_23 : f32 to vector<1x128xf32>
        %c0_24 = arith.constant 0 : index
        %c0_25 = arith.constant 0 : index
        %36 = vector.load %arg15[%c0_24, %c0_25] : memref<1x128xf32, #tpu.memory_space<vmem>>, vector<1x128xf32>
        tpu.vector_store %arg15[%c0_24, %c0_25], %35 {strides = array<i32>} : memref<1x128xf32, #tpu.memory_space<vmem>>, vector<1x128xf32>,
      } else {
      }
      %c0 = arith.constant 0 : index
      %c0_5 = arith.constant 0 : index
      %14 = vector.load %arg2[%c0, %c0_5] : memref<128x64xbf16, #tpu.memory_space<vmem>>, vector<128x64xbf16>
      %c0_6 = arith.constant 0 : index
      %c0_7 = arith.constant 0 : index
      %15 = vector.load %arg3[%c0_6, %c0_7] : memref<64x128xbf16, #tpu.memory_space<vmem>>, vector<64x128xbf16>
      %cst = arith.constant dense<0.000000e+00> : vector<128x128xf32>
      %16 = tpu.matmul %14, %15, %cst {dimension_numbers = #tpu.dot_dimension_numbers<[1], [0], [0], [1], [0, 0, 1, 1], [], []>} : vector<128x64xbf16>, vector<64x128xbf16>, vector<128x128xf32> -> vector<128x128xf32>
      %17 = arith.index_cast %1 : i32 to index
      %c0_8 = arith.constant 0 : index
      %18 = vector.load %arg12[%17, %c0_8] : memref<512x128xf32, #tpu.memory_space<vmem>>, vector<128x128xf32>
      tpu.vector_store %arg12[%17, %c0_8], %16 {strides = array<i32>} : memref<512x128xf32, #tpu.memory_space<vmem>>, vector<128x128xf32>,
      %c0_9 = arith.constant 0 : index
      %c0_10 = arith.constant 0 : index
      %19 = vector.load %arg14[%c0_9, %c0_10] : memref<1x128xf32, #tpu.memory_space<vmem>>, vector<1x128xf32>
      %cst_11 = arith.constant dense<0.000000e+00> : vector<128xf32>
      %20 = vector.multi_reduction <add>, %16, %cst_11 [0] : vector<128x128xf32> to vector<128xf32>
      %21 = vector.shape_cast %20 : vector<128xf32> to vector<1x128xf32>
      %22 = arith.addf %19, %21 : vector<1x128xf32>
      %c0_12 = arith.constant 0 : index
      %c0_13 = arith.constant 0 : index
      %23 = vector.load %arg14[%c0_12, %c0_13] : memref<1x128xf32, #tpu.memory_space<vmem>>, vector<1x128xf32>
      tpu.vector_store %arg14[%c0_12, %c0_13], %22 {strides = array<i32>} : memref<1x128xf32, #tpu.memory_space<vmem>>, vector<1x128xf32>,
      %c0_14 = arith.constant 0 : index
      %c0_15 = arith.constant 0 : index
      %24 = vector.load %arg15[%c0_14, %c0_15] : memref<1x128xf32, #tpu.memory_space<vmem>>, vector<1x128xf32>
      %25 = arith.mulf %16, %16 : vector<128x128xf32>
      %cst_16 = arith.constant dense<0.000000e+00> : vector<128xf32>
      %26 = vector.multi_reduction <add>, %25, %cst_16 [0] : vector<128x128xf32> to vector<128xf32>
      %27 = vector.shape_cast %26 : vector<128xf32> to vector<1x128xf32>
      %28 = arith.addf %24, %27 : vector<1x128xf32>
      %c0_17 = arith.constant 0 : index
      %c0_18 = arith.constant 0 : index
      %29 = vector.load %arg15[%c0_17, %c0_18] : memref<1x128xf32, #tpu.memory_space<vmem>>, vector<1x128xf32>
      tpu.vector_store %arg15[%c0_17, %c0_18], %28 {strides = array<i32>} : memref<1x128xf32, #tpu.memory_space<vmem>>, vector<1x128xf32>,
      %c3_i32 = arith.constant 3 : i32
      %30 = arith.cmpi eq, %arg1, %c3_i32 : i32
      %31 = arith.extui %30 : i1 to i32
      %c0_i32_19 = arith.constant 0 : i32
      %32 = arith.cmpi ne, %31, %c0_i32_19 : i32
      scf.if %32 {
        %c0_20 = arith.constant 0 : index
        %c0_21 = arith.constant 0 : index
        %33 = vector.load %arg14[%c0_20, %c0_21] : memref<1x128xf32, #tpu.memory_space<vmem>>, vector<1x128xf32>
        %cst_22 = arith.constant 0.001953125 : f32
        %34 = vector.broadcast %cst_22 : f32 to vector<1x128xf32>
        %35 = arith.mulf %33, %34 : vector<1x128xf32>
        %c0_23 = arith.constant 0 : index
        %c0_24 = arith.constant 0 : index
        %36 = vector.load %arg15[%c0_23, %c0_24] : memref<1x128xf32, #tpu.memory_space<vmem>>, vector<1x128xf32>
        %cst_25 = arith.constant 0.001953125 : f32
        %37 = vector.broadcast %cst_25 : f32 to vector<1x128xf32>
        %38 = arith.mulf %36, %37 : vector<1x128xf32>
        %39 = arith.mulf %35, %35 : vector<1x128xf32>
        %40 = arith.subf %38, %39 : vector<1x128xf32>
        %c0_26 = arith.constant 0 : index
        %c0_27 = arith.constant 0 : index
        %41 = vector.load %arg14[%c0_26, %c0_27] : memref<1x128xf32, #tpu.memory_space<vmem>>, vector<1x128xf32>
        tpu.vector_store %arg14[%c0_26, %c0_27], %35 {strides = array<i32>} : memref<1x128xf32, #tpu.memory_space<vmem>>, vector<1x128xf32>,
        %cst_28 = arith.constant 9.99999974E-6 : f32
        %42 = vector.broadcast %cst_28 : f32 to vector<1x128xf32>
        %43 = arith.addf %40, %42 : vector<1x128xf32>
        %44 = math.rsqrt %43 : vector<1x128xf32>
        %c0_29 = arith.constant 0 : index
        %c0_30 = arith.constant 0 : index
        %45 = vector.load %arg15[%c0_29, %c0_30] : memref<1x128xf32, #tpu.memory_space<vmem>>, vector<1x128xf32>
        tpu.vector_store %arg15[%c0_29, %c0_30], %44 {strides = array<i32>} : memref<1x128xf32, #tpu.memory_space<vmem>>, vector<1x128xf32>,
      } else {
      }
    } else {
    }
    %c1_i32 = arith.constant 1 : i32
    %5 = arith.cmpi eq, %arg0, %c1_i32 : i32
    %6 = arith.extui %5 : i1 to i32
    %c0_i32_1 = arith.constant 0 : i32
    %7 = arith.cmpi ne, %6, %c0_i32_1 : i32
    scf.if %7 {
      %c0_i32_3 = arith.constant 0 : i32
      %11 = arith.cmpi eq, %arg1, %c0_i32_3 : i32
      %12 = arith.extui %11 : i1 to i32
      %c0_i32_4 = arith.constant 0 : i32
      %13 = arith.cmpi ne, %12, %c0_i32_4 : i32
      scf.if %13 {
        %cst_28 = arith.constant 0.000000e+00 : f32
        %49 = vector.broadcast %cst_28 : f32 to vector<1x128xf32>
        %c0_29 = arith.constant 0 : index
        %c0_30 = arith.constant 0 : index
        %50 = vector.load %arg16[%c0_29, %c0_30] : memref<1x128xf32, #tpu.memory_space<vmem>>, vector<1x128xf32>
        tpu.vector_store %arg16[%c0_29, %c0_30], %49 {strides = array<i32>} : memref<1x128xf32, #tpu.memory_space<vmem>>, vector<1x128xf32>,
        %cst_31 = arith.constant 0.000000e+00 : f32
        %51 = vector.broadcast %cst_31 : f32 to vector<1x128xf32>
        %c0_32 = arith.constant 0 : index
        %c0_33 = arith.constant 0 : index
        %52 = vector.load %arg17[%c0_32, %c0_33] : memref<1x128xf32, #tpu.memory_space<vmem>>, vector<1x128xf32>
        tpu.vector_store %arg17[%c0_32, %c0_33], %51 {strides = array<i32>} : memref<1x128xf32, #tpu.memory_space<vmem>>, vector<1x128xf32>,
      } else {
      }
      %14 = arith.index_cast %1 : i32 to index
      %c0 = arith.constant 0 : index
      %15 = vector.load %arg12[%14, %c0] : memref<512x128xf32, #tpu.memory_space<vmem>>, vector<128x128xf32>
      %c0_5 = arith.constant 0 : index
      %c0_6 = arith.constant 0 : index
      %16 = vector.load %arg14[%c0_5, %c0_6] : memref<1x128xf32, #tpu.memory_space<vmem>>, vector<1x128xf32>
      %17 = vector.broadcast %16 : vector<1x128xf32> to vector<128x128xf32>
      %18 = arith.subf %15, %17 : vector<128x128xf32>
      %c0_7 = arith.constant 0 : index
      %c0_8 = arith.constant 0 : index
      %19 = vector.load %arg15[%c0_7, %c0_8] : memref<1x128xf32, #tpu.memory_space<vmem>>, vector<1x128xf32>
      %20 = vector.broadcast %19 : vector<1x128xf32> to vector<128x128xf32>
      %21 = arith.mulf %18, %20 : vector<128x128xf32>
      %c0_9 = arith.constant 0 : index
      %c0_10 = arith.constant 0 : index
      %22 = vector.load %arg4[%c0_9, %c0_10] : memref<1x128xf32, #tpu.memory_space<vmem>>, vector<1x128xf32>
      %23 = vector.broadcast %22 : vector<1x128xf32> to vector<128x128xf32>
      %24 = arith.mulf %21, %23 : vector<128x128xf32>
      %c0_11 = arith.constant 0 : index
      %c0_12 = arith.constant 0 : index
      %25 = vector.load %arg5[%c0_11, %c0_12] : memref<1x128xf32, #tpu.memory_space<vmem>>, vector<1x128xf32>
      %26 = vector.broadcast %25 : vector<1x128xf32> to vector<128x128xf32>
      %27 = arith.addf %24, %26 : vector<128x128xf32>
      %cst = arith.constant 0.000000e+00 : f32
      %28 = vector.broadcast %cst : f32 to vector<128x128xf32>
      %29 = arith.maximumf %27, %28 : vector<128x128xf32>
      %30 = arith.truncf %29 : vector<128x128xf32> to vector<128x128xbf16>
      %c0_13 = arith.constant 0 : index
      %c0_14 = arith.constant 0 : index
      %31 = vector.load %arg6[%c0_13, %c0_14] : memref<128x128xbf16, #tpu.memory_space<vmem>>, vector<128x128xbf16>
      %cst_15 = arith.constant dense<0.000000e+00> : vector<128x128xf32>
      %32 = tpu.matmul %30, %31, %cst_15 {dimension_numbers = #tpu.dot_dimension_numbers<[1], [0], [0], [1], [0, 0, 1, 1], [], []>} : vector<128x128xbf16>, vector<128x128xbf16>, vector<128x128xf32> -> vector<128x128xf32>
      %33 = arith.index_cast %1 : i32 to index
      %c0_16 = arith.constant 0 : index
      %34 = vector.load %arg13[%33, %c0_16] : memref<512x128xf32, #tpu.memory_space<vmem>>, vector<128x128xf32>
      tpu.vector_store %arg13[%33, %c0_16], %32 {strides = array<i32>} : memref<512x128xf32, #tpu.memory_space<vmem>>, vector<128x128xf32>,
      %c0_17 = arith.constant 0 : index
      %c0_18 = arith.constant 0 : index
      %35 = vector.load %arg16[%c0_17, %c0_18] : memref<1x128xf32, #tpu.memory_space<vmem>>, vector<1x128xf32>
      %cst_19 = arith.constant dense<0.000000e+00> : vector<128xf32>
      %36 = vector.multi_reduction <add>, %32, %cst_19 [0] : vector<128x128xf32> to vector<128xf32>
      %37 = vector.shape_cast %36 : vector<128xf32> to vector<1x128xf32>
      %38 = arith.addf %35, %37 : vector<1x128xf32>
      %c0_20 = arith.constant 0 : index
      %c0_21 = arith.constant 0 : index
      %39 = vector.load %arg16[%c0_20, %c0_21] : memref<1x128xf32, #tpu.memory_space<vmem>>, vector<1x128xf32>
      tpu.vector_store %arg16[%c0_20, %c0_21], %38 {strides = array<i32>} : memref<1x128xf32, #tpu.memory_space<vmem>>, vector<1x128xf32>,
      %c0_22 = arith.constant 0 : index
      %c0_23 = arith.constant 0 : index
      %40 = vector.load %arg17[%c0_22, %c0_23] : memref<1x128xf32, #tpu.memory_space<vmem>>, vector<1x128xf32>
      %41 = arith.mulf %32, %32 : vector<128x128xf32>
      %cst_24 = arith.constant dense<0.000000e+00> : vector<128xf32>
      %42 = vector.multi_reduction <add>, %41, %cst_24 [0] : vector<128x128xf32> to vector<128xf32>
      %43 = vector.shape_cast %42 : vector<128xf32> to vector<1x128xf32>
      %44 = arith.addf %40, %43 : vector<1x128xf32>
      %c0_25 = arith.constant 0 : index
      %c0_26 = arith.constant 0 : index
      %45 = vector.load %arg17[%c0_25, %c0_26] : memref<1x128xf32, #tpu.memory_space<vmem>>, vector<1x128xf32>
      tpu.vector_store %arg17[%c0_25, %c0_26], %44 {strides = array<i32>} : memref<1x128xf32, #tpu.memory_space<vmem>>, vector<1x128xf32>,
      %c3_i32 = arith.constant 3 : i32
      %46 = arith.cmpi eq, %arg1, %c3_i32 : i32
      %47 = arith.extui %46 : i1 to i32
      %c0_i32_27 = arith.constant 0 : i32
      %48 = arith.cmpi ne, %47, %c0_i32_27 : i32
      scf.if %48 {
        %c0_28 = arith.constant 0 : index
        %c0_29 = arith.constant 0 : index
        %49 = vector.load %arg16[%c0_28, %c0_29] : memref<1x128xf32, #tpu.memory_space<vmem>>, vector<1x128xf32>
        %cst_30 = arith.constant 0.001953125 : f32
        %50 = vector.broadcast %cst_30 : f32 to vector<1x128xf32>
        %51 = arith.mulf %49, %50 : vector<1x128xf32>
        %c0_31 = arith.constant 0 : index
        %c0_32 = arith.constant 0 : index
        %52 = vector.load %arg17[%c0_31, %c0_32] : memref<1x128xf32, #tpu.memory_space<vmem>>, vector<1x128xf32>
        %cst_33 = arith.constant 0.001953125 : f32
        %53 = vector.broadcast %cst_33 : f32 to vector<1x128xf32>
        %54 = arith.mulf %52, %53 : vector<1x128xf32>
        %55 = arith.mulf %51, %51 : vector<1x128xf32>
        %56 = arith.subf %54, %55 : vector<1x128xf32>
        %c0_34 = arith.constant 0 : index
        %c0_35 = arith.constant 0 : index
        %57 = vector.load %arg16[%c0_34, %c0_35] : memref<1x128xf32, #tpu.memory_space<vmem>>, vector<1x128xf32>
        tpu.vector_store %arg16[%c0_34, %c0_35], %51 {strides = array<i32>} : memref<1x128xf32, #tpu.memory_space<vmem>>, vector<1x128xf32>,
        %cst_36 = arith.constant 9.99999974E-6 : f32
        %58 = vector.broadcast %cst_36 : f32 to vector<1x128xf32>
        %59 = arith.addf %56, %58 : vector<1x128xf32>
        %60 = math.rsqrt %59 : vector<1x128xf32>
        %c0_37 = arith.constant 0 : index
        %c0_38 = arith.constant 0 : index
        %61 = vector.load %arg17[%c0_37, %c0_38] : memref<1x128xf32, #tpu.memory_space<vmem>>, vector<1x128xf32>
        tpu.vector_store %arg17[%c0_37, %c0_38], %60 {strides = array<i32>} : memref<1x128xf32, #tpu.memory_space<vmem>>, vector<1x128xf32>,
      } else {
      }
    } else {
    }
    %c2_i32 = arith.constant 2 : i32
    %8 = arith.cmpi eq, %arg0, %c2_i32 : i32
    %9 = arith.extui %8 : i1 to i32
    %c0_i32_2 = arith.constant 0 : i32
    %10 = arith.cmpi ne, %9, %c0_i32_2 : i32
    scf.if %10 {
      %11 = arith.index_cast %1 : i32 to index
      %c0 = arith.constant 0 : index
      %12 = vector.load %arg13[%11, %c0] : memref<512x128xf32, #tpu.memory_space<vmem>>, vector<128x128xf32>
      %c0_3 = arith.constant 0 : index
      %c0_4 = arith.constant 0 : index
      %13 = vector.load %arg16[%c0_3, %c0_4] : memref<1x128xf32, #tpu.memory_space<vmem>>, vector<1x128xf32>
      %14 = vector.broadcast %13 : vector<1x128xf32> to vector<128x128xf32>
      %15 = arith.subf %12, %14 : vector<128x128xf32>
      %c0_5 = arith.constant 0 : index
      %c0_6 = arith.constant 0 : index
      %16 = vector.load %arg17[%c0_5, %c0_6] : memref<1x128xf32, #tpu.memory_space<vmem>>, vector<1x128xf32>
      %17 = vector.broadcast %16 : vector<1x128xf32> to vector<128x128xf32>
      %18 = arith.mulf %15, %17 : vector<128x128xf32>
      %c0_7 = arith.constant 0 : index
      %c0_8 = arith.constant 0 : index
      %19 = vector.load %arg7[%c0_7, %c0_8] : memref<1x128xf32, #tpu.memory_space<vmem>>, vector<1x128xf32>
      %20 = vector.broadcast %19 : vector<1x128xf32> to vector<128x128xf32>
      %21 = arith.mulf %18, %20 : vector<128x128xf32>
      %c0_9 = arith.constant 0 : index
      %c0_10 = arith.constant 0 : index
      %22 = vector.load %arg8[%c0_9, %c0_10] : memref<1x128xf32, #tpu.memory_space<vmem>>, vector<1x128xf32>
      %23 = vector.broadcast %22 : vector<1x128xf32> to vector<128x128xf32>
      %24 = arith.addf %21, %23 : vector<128x128xf32>
      %cst = arith.constant 0.000000e+00 : f32
      %25 = vector.broadcast %cst : f32 to vector<128x128xf32>
      %26 = arith.maximumf %24, %25 : vector<128x128xf32>
      %c0_11 = arith.constant 0 : index
      %c0_12 = arith.constant 0 : index
      %27 = vector.load %arg9[%c0_11, %c0_12] : memref<1x128xf32, #tpu.memory_space<vmem>>, vector<1x128xf32>
      %28 = vector.broadcast %27 : vector<1x128xf32> to vector<128x128xf32>
      %29 = arith.mulf %26, %28 : vector<128x128xf32>
      %cst_13 = arith.constant dense<0.000000e+00> : vector<128xf32>
      %30 = vector.multi_reduction <add>, %29, %cst_13 [1] : vector<128x128xf32> to vector<128xf32>
      %c0_14 = arith.constant 0 : index
      %31 = memref.load %arg10[%c0_14] : memref<1xf32, #tpu.memory_space<smem>>
      %32 = vector.broadcast %31 : f32 to vector<128xf32>
      %33 = arith.addf %30, %32 : vector<128xf32>
      %34 = vector.shape_cast %33 : vector<128xf32> to vector<1x128xf32>
      %c0_15 = arith.constant 0 : index
      %c0_16 = arith.constant 0 : index
      %35 = vector.load %arg11[%c0_15, %c0_16] : memref<1x128xf32, #tpu.memory_space<vmem>>, vector<1x128xf32>
      tpu.vector_store %arg11[%c0_15, %c0_16], %34 {strides = array<i32>} : memref<1x128xf32, #tpu.memory_space<vmem>>, vector<1x128xf32>,
    } else {
    }
    return
  }
  func.func @transform_0(%arg0: i32, %arg1: i32) -> (i32, i32) {
    %c0_i32 = arith.constant 0 : i32
    %c0_i32_0 = arith.constant 0 : i32
    return %arg1, %c0_i32 : i32, i32
  }
  func.func @transform_1(%arg0: i32, %arg1: i32) -> (i32, i32) {
    %c0_i32 = arith.constant 0 : i32
    %c0_i32_0 = arith.constant 0 : i32
    %c0_i32_1 = arith.constant 0 : i32
    return %c0_i32, %c0_i32_0 : i32, i32
  }
  func.func @transform_2(%arg0: i32, %arg1: i32) -> (i32, i32) {
    %c0_i32 = arith.constant 0 : i32
    %c0_i32_0 = arith.constant 0 : i32
    %c0_i32_1 = arith.constant 0 : i32
    return %c0_i32, %c0_i32_0 : i32, i32
  }
  func.func @transform_3(%arg0: i32, %arg1: i32) -> (i32, i32) {
    %c0_i32 = arith.constant 0 : i32
    %c0_i32_0 = arith.constant 0 : i32
    %c0_i32_1 = arith.constant 0 : i32
    return %c0_i32, %c0_i32_0 : i32, i32
  }
  func.func @transform_4(%arg0: i32, %arg1: i32) -> (i32, i32) {
    %c0_i32 = arith.constant 0 : i32
    %c0_i32_0 = arith.constant 0 : i32
    %c0_i32_1 = arith.constant 0 : i32
    return %c0_i32, %c0_i32_0 : i32, i32
  }
  func.func @transform_5(%arg0: i32, %arg1: i32) -> (i32, i32) {
    %c0_i32 = arith.constant 0 : i32
    %c0_i32_0 = arith.constant 0 : i32
    %c0_i32_1 = arith.constant 0 : i32
    return %c0_i32, %c0_i32_0 : i32, i32
  }
  func.func @transform_6(%arg0: i32, %arg1: i32) -> (i32, i32) {
    %c0_i32 = arith.constant 0 : i32
    %c0_i32_0 = arith.constant 0 : i32
    %c0_i32_1 = arith.constant 0 : i32
    return %c0_i32, %c0_i32_0 : i32, i32
  }
  func.func @transform_7(%arg0: i32, %arg1: i32) -> (i32, i32) {
    %c0_i32 = arith.constant 0 : i32
    %c0_i32_0 = arith.constant 0 : i32
    %c0_i32_1 = arith.constant 0 : i32
    return %c0_i32, %c0_i32_0 : i32, i32
  }
  func.func @transform_8(%arg0: i32, %arg1: i32) -> i32 {
    %c0_i32 = arith.constant 0 : i32
    %c0_i32_0 = arith.constant 0 : i32
    return %c0_i32 : i32
  }
  func.func @transform_9(%arg0: i32, %arg1: i32) -> (i32, i32) {
    %c0_i32 = arith.constant 0 : i32
    %c0_i32_0 = arith.constant 0 : i32
    return %c0_i32, %arg1 : i32, i32
  }
}

</mosaic_0001>

<bundles_post_ra>
// kernel: tpu_custom_call.1
= control target key start
LH: loop header
LB: loop body
LE: loop exit
PB: predicated region body
PF: predicated region fallthrough
CT: control target
= control target key end

     0   :  { %s2394_s0 = inlined_call_operand.vmem [shape: bf16[512,64], index: 0, kind: input, shape index: {}]   ;;  %s2395_s1 = inlined_call_operand.vmem [shape: bf16[64,128], index: 1, kind: input, shape index: {}]   ;;  %s2396_s2 = inlined_call_operand.vmem [shape: f32[1,128], index: 2, kind: input, shape index: {}]   ;;  %s2397_s3 = inlined_call_operand.vmem [shape: f32[1,128], index: 3, kind: input, shape index: {}]   ;;  %s2398_s4 = inlined_call_operand.vmem [shape: bf16[128,128], index: 4, kind: input, shape index: {}]   ;;  %s2399_s5 = inlined_call_operand.vmem [shape: f32[1,128], index: 5, kind: input, shape index: {}]   ;;  %s2400_s6 = inlined_call_operand.vmem [shape: f32[1,128], index: 6, kind: input, shape index: {}]   ;;  %s2401_s7 = inlined_call_operand.vmem [shape: f32[1,128], index: 7, kind: input, shape index: {}]   ;;  %s2402_s8 = inlined_call_operand.<no memory space> [shape: f32[1], index: 8, kind: input, shape index: {}]   ;;  %s2403_s9 = inlined_call_operand.hbm [shape: f32[1,512], index: 9, kind: output, shape index: {}]  }
   0x1   :  { %2405 = sst [smem:[#allocation13_spill]] %s2394_s0 }
   0x2   :  { %14 = sst [smem:[#allocation8]] %s2402_s8 }
   0x3   :  { %15 = vsyncpa [#allocation10], 0 }
   0x4   :  { %17 = vsyncpa [#allocation10 + $0x1], 0  ;;  %s1889_s11 = smov 0   ;;  %s1891_s12 = smov 0  }
   0x5   :  { %s1893_s13 = smov 0   ;;  %s1895_s14 = smov 0  }
   0x6   :  { %s1897_s15 = smov 0   ;;  %s1899_s16 = smov 0  }
   0x7   :  { %s1901_s17 = smov 0   ;;  %s1903_s18 = smov 0  }
   0x8 LB: > { %s1479_s8 = sadd.s32 4294967295, %s1831_s18   ;;  %s1480_s19 = sadd.s32 4294967294, %s1831_s18   ;;  %s1831_s18 = sphi %s1903_s18, %s23_s18   ;;  %s1827_s17 = sphi %s1901_s17, %s2418_s17   ;;  %s1823_s16 = sphi %s1899_s16, %s2417_s16   ;;  %s1819_s15 = sphi %s1897_s15, %s2416_s15   ;;  %s1815_s14 = sphi %s1895_s14, %s2415_s14   ;;  %s1811_s13 = sphi %s1893_s13, %s2414_s13   ;;  %s1807_s12 = sphi %s1891_s12, %s2413_s12   ;;  %s1803_s11 = sphi %s1889_s11, %s2412_s11  }
   0x9   : > { %s32_s20 = sadd.s32 1, %s1823_s16  ;;  %s35_s21 = sadd.s32 1, %s1827_s17 }
   0xa   : > { %p33_p0 = scmp.ge.s32.totalorder %s32_s20, 4  ;;  %s236_s22 = sadd.s32 1, %s1811_s13 }
   0xb   : > { %p246_p1 = scmp.ne.s32.totalorder %s1811_s13, %s1807_s12  ;;  %p247_p2 = scmp.eq.s32.totalorder %s1479_s8, 11 }
   0xc   : > { %s2420_s20 = smov (%p33_p0, %s32_s20), 0  ;;  %s2422_s21 = smov (!%p33_p0, %s35_s21), %s1827_s17 }
   0xd   : > { %s233_s23 = ssub.s32 %s1823_s16, %s2420_s20  ;;  %p1941_p3 = por %p247_p2, %p246_p1 }
   0xe   : > { %p37_p4 = scmp.ge.s32.totalorder %s2422_s21, 3  ;;  %p234_p5 = scmp.eq.s32.totalorder %s233_s23, 0 }
   0xf   : > { %p252_p6 = scmp.ne.s32.totalorder %s1807_s12, %s1803_s11  ;;  %p253_p7 = scmp.eq.s32.totalorder %s1480_s19, 11 }
  0x10   : > { %s2424_s21 = smov (%p37_p4, %s2422_s21), 0  ;;  %p1483_p9 = scmp.ge.s32.totalorder %s1831_s18, 1 }
  0x11   : > { %2407 = sst [smem:[#allocation12_spill]] %s2424_s21  ;;  %p1952_p8 = por %p253_p7, %p252_p6 }
  0x12   : > { %s1950_s25 = scalar_select %p234_p5, %s1811_s13, %s236_s22  }
  0x13   : > { %p304_p10 = scmp.lt.s32.totalorder %s1831_s18, 13 }
  0x15   : > { %p305_p11 = pnand %p1483_p9, %p304_p10 }
  0x16   : > { %s2404_s27 = sand.u32 (!%p305_p11), 1, %s1807_s12   ;;  %s1960_s28 = sshll.u32 (!%p305_p11), %s1815_s14, 4 }
  0x17   : > { %308 = sbr.rel (%p305_p11) target bundleno = 871 (0x367), region = 56  ;;  %p340_p12 = scmp.lt.s32.totalorder (!%p305_p11), %s1960_s28, 63 }
  0x18   : > { %s1964_s29 = sshll.u32 (!%p305_p11), %s1815_s14, 7  ;;  %s2409_s0 = sld [smem:[#allocation13_spill]] (!%p305_p11) }
  0x19   : > { %s1974_s23 = scalar_lea.vmem (!%p305_p11), [#allocation9], %s2404_s27  ;;  %p1487_p13 = scmp.ne.s32.totalorder (!%p305_p11), %s1819_s15, 0 }
  0x1c   : > { %s341_s30 = scalar_select %p340_p12, %s1960_s28, 63 }
  0x1d   : > { %350 = sbr.rel (%p1487_p13) target bundleno = 332 (0x14c), region = 60  ;;  %p1488_p0 = scmp.ne.s32.totalorder (!%p1487_p13), %s1815_s14, 0 }
  0x1e   : > { %s1485_s10 = sshll.u32 %s341_s30, 2 }
  0x1f   : > { %s1970_s22 = scalar_lea.vmem %s2409_s0, %s1485_s10 }
  0x22   : > { %354 = sbr.rel (%p1488_p0) target bundleno = 41 (0x29), region = 64 }
  0x27   : > { %v1833_v0 = vmov 0.0  }
  0x28   : > { %355 = vst [vmem:[#allocation4] sm:$0x1] %v1833_v0  ;;  %356 = vst [vmem:[#allocation5] sm:$0x1] %v1833_v0 }
  0x29 PF: > { %v1715_v1 = vld [vmem:[%s2395_s1 + $0x18] sm:$0xff]   ;;  %v1716_v2 = vld [vmem:[%s2395_s1 + $0x10] sm:$0xff]   ;;  %v1717_v3 = vld [vmem:[%s2395_s1 + $0x8] sm:$0xff]   ;;  %vm445_vm0 = vcmask 523264   ;;  %s2007_s27 = scalar_lea.vmem [#allocation2], %s1964_s29  ;;  %p1509_p1 = scmp.ne.s32.totalorder %s1815_s14, 3 }
  0x2a   : > { %1562 = vmatprep.subr.bf16.mxu0 %v1715_v1  ;;  %1618 = vmatprep.subr.bf16.mxu1 %v1715_v1  ;;  %v1719_v4 = vld [vmem:[%s1970_s22] sm:$0xff]   ;;  %v1720_v7 = vld [vmem:[%s1970_s22 + $0x8] sm:$0xff]   ;;  %v1721_v9 = vld [vmem:[%s1970_s22 + $0x10] sm:$0xff]  }
  0x2b   : > { %1563 = vmatpush3.bf16.msra.mxu0 %v1715_v1  ;;  %1622 = vmatpush3.bf16.msra.mxu1 %v1715_v1  ;;  %v1718_v5 = vld [vmem:[%s2395_s1] sm:$0xff]   ;;  %v1724_v8 = vld [vmem:[%s1970_s22 + $0x28] sm:$0xff]   ;;  %v1725_v10 = vld [vmem:[%s1970_s22 + $0x30] sm:$0xff]  }
  0x2c   : > { %1564 = vmatprep.subr.bf16.mxu0 %v1716_v2  ;;  %1619 = vmatprep.subr.bf16.mxu1 %v1716_v2  ;;  %v1723_v6 = vld [vmem:[%s1970_s22 + $0x20] sm:$0xff]   ;;  %v1722_v11 = vld [vmem:[%s1970_s22 + $0x18] sm:$0xff]  }
  0x2d   : > { %1570 = vmatprep.mubr.msk.bf16.mxu0 %vm445_vm0, %v1719_v4  ;;  %1578 = vmatprep.mubr.msk.bf16.mxu1 %vm445_vm0, %v1723_v6  ;;  %v1726_v12 = vld [vmem:[%s1970_s22 + $0x38] sm:$0xff]  }
  0x2f   : > { %1565 = vmatpush3.bf16.msra.mxu0 %v1716_v2  ;;  %1623 = vmatpush3.bf16.msra.mxu1 %v1716_v2 }
  0x30   : > { %1566 = vmatprep.subr.bf16.mxu0 %v1717_v3  ;;  %1620 = vmatprep.subr.bf16.mxu1 %v1717_v3 }
  0x33   : > { %1567 = vmatpush3.bf16.msra.mxu0 %v1717_v3  ;;  %1624 = vmatpush3.bf16.msra.mxu1 %v1717_v3 }
  0x34   : > { %1568 = vmatprep.subr.bf16.mxu0 %v1718_v5  ;;  %1621 = vmatprep.subr.bf16.mxu1 %v1718_v5 }
  0x37   : > { %1569 = vmatpush3.bf16.msra.mxu0 %v1718_v5  ;;  %1625 = vmatpush3.bf16.msra.mxu1 %v1718_v5 }
  0x3a   : > { %1571 = vmatmul.mubr.msk.bf16.vlgmr.msra.gmra.mxu0 %vm445_vm0, %v1720_v7  ;;  %1579 = vmatmul.mubr.msk.bf16.vlgmr.msra.gmra.mxu1 %vm445_vm0, %v1724_v8 }
  0x3b   : > { %1574 = vmatprep.mubr.msk.bf16.mxu0 %vm445_vm0, %v1721_v9  ;;  %1582 = vmatprep.mubr.msk.bf16.mxu1 %vm445_vm0, %v1725_v10 }
  0x42   : > { %1575 = vmatmul.mubr.msk.bf16.gmra.mxu0 %vm445_vm0, %v1722_v11  ;;  %1583 = vmatmul.mubr.msk.bf16.gmra.mxu1 %vm445_vm0, %v1726_v12 }
  0xfa   : > { %v1572_v13 = vpop.f32.mrf.mxu0  ;;  %v1580_v14 = vpop.f32.mrf.mxu1 }
  0xfb   : > { %570 = vst [vmem:[%s2007_s27 + $0x10] sm:$0xff] %v1572_v13  ;;  %578 = vst [vmem:[%s2007_s27 + $0x50] sm:$0xff] %v1580_v14  ;;  %v611_v26 = vmul.f32 %v1572_v13, %v1572_v13  ;;  %v619_v56 = vmul.f32 %v1580_v14, %v1580_v14 }
  0xfc   : > { %v504_v15 = vpop.f32.mrf.mxu0  ;;  %v536_v16 = vpop.f32.mrf.mxu1 }
  0xfd   : > { %568 = vst [vmem:[%s2007_s27] sm:$0xff] %v504_v15  ;;  %576 = vst [vmem:[%s2007_s27 + $0x40] sm:$0xff] %v536_v16  ;;  %v609_v21 = vmul.f32 %v504_v15, %v504_v15  ;;  %v617_v50 = vmul.f32 %v536_v16, %v536_v16 }
  0xfe   : > { %v1573_v17 = vpop.f32.mrf.mxu0  ;;  %v1581_v18 = vpop.f32.mrf.mxu1 }
  0xff   : > { %571 = vst [vmem:[%s2007_s27 + $0x18] sm:$0xff] %v1573_v17  ;;  %579 = vst [vmem:[%s2007_s27 + $0x58] sm:$0xff] %v1581_v18  ;;  %v612_v31 = vmul.f32 %v1573_v17, %v1573_v17  ;;  %v620_v59 = vmul.f32 %v1581_v18, %v1581_v18 }
 0x100   : > { %v507_v19 = vpop.f32.mrf.mxu0  ;;  %v539_v20 = vpop.f32.mrf.mxu1 }
 0x101   : > { %569 = vst [vmem:[%s2007_s27 + $0x8] sm:$0xff] %v507_v19  ;;  %v585_v22 = vadd.f32 %v507_v19, %v504_v15  ;;  %v610_v23 = vmul.f32 %v507_v19, %v507_v19  ;;  %577 = vst [vmem:[%s2007_s27 + $0x48] sm:$0xff] %v539_v20  ;;  %v618_v54 = vmul.f32 %v539_v20, %v539_v20 }
 0x102   : > { %v1576_v24 = vpop.f32.mrf.mxu0  ;;  %v1584_v25 = vpop.f32.mrf.mxu1 }
 0x103   : > { %v586_v27 = vadd.f32 %v1572_v13, %v585_v22  ;;  %v625_v28 = vadd.f32 %v610_v23, %v609_v21  ;;  %574 = vst [vmem:[%s2007_s27 + $0x30] sm:$0xff] %v1576_v24  ;;  %582 = vst [vmem:[%s2007_s27 + $0x70] sm:$0xff] %v1584_v25  ;;  %v615_v44 = vmul.f32 %v1576_v24, %v1576_v24  ;;  %v608_v23 = vld [vmem:[#allocation5] sm:$0x1] }
 0x104   : > { %v520_v29 = vpop.f32.mrf.mxu0  ;;  %v552_v30 = vpop.f32.mrf.mxu1  ;;  %v623_v4 = vmul.f32 %v1584_v25, %v1584_v25 }
 0x105   : > { %v626_v32 = vadd.f32 %v625_v28, %v611_v26  ;;  %572 = vst [vmem:[%s2007_s27 + $0x20] sm:$0xff] %v520_v29  ;;  %v587_v33 = vadd.f32 %v1573_v17, %v586_v27  ;;  %580 = vst [vmem:[%s2007_s27 + $0x60] sm:$0xff] %v552_v30  ;;  %v613_v37 = vmul.f32 %v520_v29, %v520_v29 }
 0x106   : > { %v1577_v34 = vpop.f32.mrf.mxu0  ;;  %v1585_v35 = vpop.f32.mrf.mxu1  ;;  %v621_v63 = vmul.f32 %v552_v30, %v552_v30 }
 0x107   : > { %v588_v36 = vadd.f32 %v587_v33, %v520_v29  ;;  %v627_v38 = vadd.f32 %v626_v32, %v612_v31  ;;  %575 = vst [vmem:[%s2007_s27 + $0x38] sm:$0xff] %v1577_v34  ;;  %583 = vst [vmem:[%s2007_s27 + $0x78] sm:$0xff] %v1585_v35  ;;  %v616_v47 = vmul.f32 %v1577_v34, %v1577_v34 }
 0x108   : > { %v523_v39 = vpop.f32.mrf.mxu0  ;;  %v555_v40 = vpop.f32.mrf.mxu1  ;;  %v624_v7 = vmul.f32 %v1585_v35, %v1585_v35 }
 0x109   : > { %v628_v41 = vadd.f32 %v627_v38, %v613_v37  ;;  %573 = vst [vmem:[%s2007_s27 + $0x28] sm:$0xff] %v523_v39  ;;  %v589_v42 = vadd.f32 %v588_v36, %v523_v39  ;;  %v614_v43 = vmul.f32 %v523_v39, %v523_v39  ;;  %581 = vst [vmem:[%s2007_s27 + $0x68] sm:$0xff] %v555_v40 }
 0x10a   : > { %v622_v3 = vmul.f32 %v555_v40, %v555_v40 }
 0x10b   : > { %v590_v45 = vadd.f32 %v1576_v24, %v589_v42  ;;  %v629_v46 = vadd.f32 %v628_v41, %v614_v43 }
 0x10d   : > { %v591_v48 = vadd.f32 %v1577_v34, %v590_v45  ;;  %v630_v49 = vadd.f32 %v629_v46, %v615_v44 }
 0x10f   : > { %v631_v51 = vadd.f32 %v630_v49, %v616_v47  ;;  %v592_v52 = vadd.f32 %v591_v48, %v536_v16 }
 0x111   : > { %v593_v53 = vadd.f32 %v592_v52, %v539_v20  ;;  %v632_v55 = vadd.f32 %v631_v51, %v617_v50  ;;  %v584_v20 = vld [vmem:[#allocation4] sm:$0x1] }
 0x113   : > { %v594_v57 = vadd.f32 %v1580_v14, %v593_v53  ;;  %v633_v58 = vadd.f32 %v632_v55, %v618_v54 }
 0x115   : > { %v634_v60 = vadd.f32 %v633_v58, %v619_v56  ;;  %v595_v61 = vadd.f32 %v1581_v18, %v594_v57 }
 0x117   : > { %v596_v62 = vadd.f32 %v595_v61, %v552_v30  ;;  %v635_v0 = vadd.f32 %v634_v60, %v620_v59 }
 0x119   : > { %v636_v1 = vadd.f32 %v635_v0, %v621_v63  ;;  %v597_v2 = vadd.f32 %v596_v62, %v555_v40 }
 0x11b   : > { %v598_v5 = vadd.f32 %v1584_v25, %v597_v2  ;;  %v637_v6 = vadd.f32 %v636_v1, %v622_v3 }
 0x11d   : > { %v599_v8 = vadd.f32 %v1585_v35, %v598_v5  ;;  %v638_v9 = vadd.f32 %v637_v6, %v623_v4 }
 0x11f   : > { %v600_v10 = vrot.slane %v599_v8, 4  ;;  %v639_v11 = vadd.f32 %v638_v9, %v624_v7 }
 0x121   : > { %v601_v12 = vadd.f32 %v600_v10, %v599_v8  ;;  %v640_v13 = vrot.slane %v639_v11, 4 }
 0x123   : > { %v602_v14 = vrot.slane %v601_v12, 2  ;;  %v641_v15 = vadd.f32 %v640_v13, %v639_v11 }
 0x125   : > { %v603_v16 = vadd.f32 %v602_v14, %v601_v12  ;;  %v642_v17 = vrot.slane %v641_v15, 2 }
 0x127   : > { %v604_v18 = vrot.slane %v603_v16, 1  ;;  %v643_v19 = vadd.f32 %v642_v17, %v641_v15 }
 0x129   : > { %v605_v21 = vadd.f32 %v604_v18, %v603_v16  ;;  %v644_v22 = vrot.slane %v643_v19, 1 }
 0x12b   : > { %v606_v24 = vadd.f32 %v605_v21, %v584_v20  ;;  %v645_v25 = vadd.f32 %v644_v22, %v643_v19  ;;  %651 = sbr.rel (%p1509_p1) target bundleno = 332 (0x14c), region = 68 }
 0x12d   : > { %607 = vst [vmem:[#allocation4] sm:$0x1] %v606_v24  ;;  %v646_v26 = vadd.f32 %v645_v25, %v608_v23 }
 0x12f   : > { %647 = vst [vmem:[#allocation5] sm:$0x1] %v646_v26 }
 0x134   : > { %v652_v27 = vld [vmem:[#allocation4] sm:$0x1] }
 0x135   : > { %v653_v29 = vmul.f32 0.001953125, %v652_v27 }
 0x136   : > { %v654_v28 = vld [vmem:[#allocation5] sm:$0x1] }
 0x137   : > { %v655_v30 = vmul.f32 0.001953125, %v654_v28  ;;  %v656_v31 = vmul.f32 %v653_v29, %v653_v29  ;;  %658 = vst [vmem:[#allocation4] sm:$0x1] %v653_v29 }
 0x139   : > { %v657_v32 = vsub.f32 %v655_v30, %v656_v31 }
 0x13b   : > { %v659_v33 = vadd.f32 1e-05, %v657_v32 }
 0x13d   : > { %1727 = vrsqrt.f32 %v659_v33 }
 0x14a   : > { %v1728_v34 = vpop.eup %1727 }
 0x14b   : > { %661 = vst [vmem:[#allocation5] sm:$0x1] %v1728_v34 }
 0x14c PF: > { %p1510_p2 = scmp.ne.s32.totalorder %s1819_s15, 1 }
 0x14d   : > { %p1511_p4 = scmp.ne.s32.totalorder (!%p1510_p2), %s1815_s14, 0 }
 0x14e   : > { %665 = sbr.rel (%p1510_p2) target bundleno = 653 (0x28d), region = 72 }
 0x153   : > { %669 = sbr.rel (%p1511_p4) target bundleno = 346 (0x15a), region = 76 }
 0x158   : > { %v1834_v35 = vmov 0.0  }
 0x159   : > { %670 = vst [vmem:[#allocation6] sm:$0x1] %v1834_v35  ;;  %671 = vst [vmem:[#allocation7] sm:$0x1] %v1834_v35 }
 0x15a PF: > { %v1729_v36 = vld [vmem:[%s2398_s4 + $0x38] sm:$0xff]   ;;  %v1730_v37 = vld [vmem:[%s2398_s4 + $0x30] sm:$0xff]   ;;  %v1731_v38 = vld [vmem:[%s2398_s4 + $0x28] sm:$0xff]   ;;  %s2041_s22 = scalar_lea.vmem [#allocation2], %s1964_s29  ;;  %p1524_p5 = scmp.ne.s32.totalorder %s1815_s14, 3 }
 0x15b   : > { %1586 = vmatprep.subr.bf16.mxu0 %v1729_v36  ;;  %1626 = vmatprep.subr.bf16.mxu1 %v1729_v36  ;;  %v1732_v39 = vld [vmem:[%s2398_s4 + $0x20] sm:$0xff]   ;;  %v674_v41 = vld [vmem:[%s2041_s22 + $0x8] sm:$0xff]  ;;  %v675_v47 = vld [vmem:[%s2041_s22 + $0x10] sm:$0xff] }
 0x15c   : > { %1587 = vmatpush3.bf16.msra.mxu0 %v1729_v36  ;;  %1634 = vmatpush3.bf16.msra.mxu1 %v1729_v36  ;;  %v673_v40 = vld [vmem:[%s2041_s22] sm:$0xff]  ;;  %v676_v48 = vld [vmem:[%s2041_s22 + $0x18] sm:$0xff]  ;;  %v678_v53 = vld [vmem:[%s2041_s22 + $0x28] sm:$0xff] }
 0x15d   : > { %1588 = vmatprep.subr.bf16.mxu0 %v1730_v37  ;;  %1627 = vmatprep.subr.bf16.mxu1 %v1730_v37  ;;  %v2045_v42 = vld [vmem:[#allocation4] ss:$0 sm:$0xff]  ;;  %v2049_v45 = vld [vmem:[#allocation5] ss:$0 sm:$0xff]  ;;  %v679_v54 = vld [vmem:[%s2041_s22 + $0x30] sm:$0xff] }
 0x15e   : > { %v696_v43 = vsub.f32 %v673_v40, %v2045_v42  ;;  %v697_v44 = vsub.f32 %v674_v41, %v2045_v42  ;;  %v2054_v46 = vld [vmem:[%s2396_s2] ss:$0 sm:$0xff]  ;;  %v698_v52 = vsub.f32 %v675_v47, %v2045_v42  ;;  %v680_v55 = vld [vmem:[%s2041_s22 + $0x38] sm:$0xff]  ;;  %v699_v58 = vsub.f32 %v676_v48, %v2045_v42  ;;  %v1734_v8 = vld [vmem:[%s2398_s4 + $0x10] sm:$0xff]  }
 0x15f   : > { %v677_v49 = vld [vmem:[%s2041_s22 + $0x20] sm:$0xff]  ;;  %v1733_v56 = vld [vmem:[%s2398_s4 + $0x18] sm:$0xff]   ;;  %v701_v60 = vsub.f32 %v678_v53, %v2045_v42  ;;  %v702_v0 = vsub.f32 %v679_v54, %v2045_v42  ;;  %v703_v4 = vsub.f32 %v680_v55, %v2045_v42  ;;  %v682_v21 = vld [vmem:[%s2041_s22 + $0x48] sm:$0xff] }
 0x160   : > { %1589 = vmatpush3.bf16.msra.mxu0 %v1730_v37  ;;  %1635 = vmatpush3.bf16.msra.mxu1 %v1730_v37  ;;  %v719_v50 = vmul.f32 %v2049_v45, %v696_v43  ;;  %v720_v51 = vmul.f32 %v2049_v45, %v697_v44  ;;  %v2071_v57 = vld [vmem:[%s2397_s3] ss:$0 sm:$0xff]  ;;  %v700_v59 = vsub.f32 %v677_v49, %v2045_v42  ;;  %v683_v22 = vld [vmem:[%s2041_s22 + $0x50] sm:$0xff]  ;;  %v684_v27 = vld [vmem:[%s2041_s22 + $0x58] sm:$0xff] }
 0x161   : > { %1590 = vmatprep.subr.bf16.mxu0 %v1731_v38  ;;  %1628 = vmatprep.subr.bf16.mxu1 %v1731_v38  ;;  %v721_v63 = vmul.f32 %v2049_v45, %v698_v52  ;;  %v722_v1 = vmul.f32 %v2049_v45, %v699_v58  ;;  %v724_v3 = vmul.f32 %v2049_v45, %v701_v60  ;;  %v681_v12 = vld [vmem:[%s2041_s22 + $0x40] sm:$0xff]  ;;  %v1735_v28 = vld [vmem:[%s2398_s4 + $0x8] sm:$0xff]   ;;  %v687_v41 = vld [vmem:[%s2041_s22 + $0x70] sm:$0xff] }
 0x162   : > { %v742_v61 = vmul.f32 %v2054_v46, %v719_v50  ;;  %v743_v62 = vmul.f32 %v2054_v46, %v720_v51  ;;  %v723_v2 = vmul.f32 %v2049_v45, %v700_v59  ;;  %v725_v16 = vmul.f32 %v2049_v45, %v702_v0  ;;  %v685_v35 = vld [vmem:[%s2041_s22 + $0x60] sm:$0xff]  ;;  %v686_v36 = vld [vmem:[%s2041_s22 + $0x68] sm:$0xff]  ;;  %v688_v52 = vld [vmem:[%s2041_s22 + $0x78] sm:$0xff]  ;;  %s2153_s22 = scalar_lea.vmem [#allocation3], %s1964_s29 }
 0x163   : > { %v744_v7 = vmul.f32 %v2054_v46, %v721_v63  ;;  %v745_v9 = vmul.f32 %v2054_v46, %v722_v1  ;;  %v747_v11 = vmul.f32 %v2054_v46, %v724_v3  ;;  %v726_v20 = vmul.f32 %v2049_v45, %v703_v4  ;;  %v1736_v48 = vld [vmem:[%s2398_s4] sm:$0xff]  }
 0x164   : > { %1591 = vmatpush3.bf16.msra.mxu0 %v1731_v38  ;;  %1636 = vmatpush3.bf16.msra.mxu1 %v1731_v38  ;;  %v765_v5 = vadd.f32 %v2071_v57, %v742_v61  ;;  %v766_v6 = vadd.f32 %v2071_v57, %v743_v62  ;;  %v746_v10 = vmul.f32 %v2054_v46, %v723_v2 }
 0x165   : > { %1592 = vmatprep.subr.bf16.mxu0 %v1732_v39  ;;  %1629 = vmatprep.subr.bf16.mxu1 %v1732_v39  ;;  %v767_v15 = vadd.f32 %v2071_v57, %v744_v7  ;;  %v768_v17 = vadd.f32 %v2071_v57, %v745_v9  ;;  %v770_v19 = vadd.f32 %v2071_v57, %v747_v11 }
 0x166   : > { %v781_v13 = vmax.f32 %v765_v5, 0.0  ;;  %v782_v14 = vmax.f32 %v766_v6, 0.0  ;;  %v769_v18 = vadd.f32 %v2071_v57, %v746_v10  ;;  %v748_v25 = vmul.f32 %v2054_v46, %v725_v16 }
 0x167   : > { %v783_v24 = vmax.f32 %v767_v15, 0.0  ;;  %v704_v26 = vsub.f32 %v681_v12, %v2045_v42  ;;  %v784_v29 = vmax.f32 %v768_v17, 0.0  ;;  %v786_v31 = vmax.f32 %v770_v19, 0.0 }
 0x168   : > { %1593 = vmatpush3.bf16.msra.mxu0 %v1732_v39  ;;  %1637 = vmatpush3.bf16.msra.mxu1 %v1732_v39  ;;  %v797_v23 = vpack.c.bf16 %v782_v14, %v781_v13  ;;  %v785_v30 = vmax.f32 %v769_v18, 0.0  ;;  %v705_v32 = vsub.f32 %v682_v21, %v2045_v42  ;;  %v706_v34 = vsub.f32 %v683_v22, %v2045_v42 }
 0x169   : > { %1594 = vmatprep.subr.bf16.mxu0 %v1733_v56  ;;  %1630 = vmatprep.subr.bf16.mxu1 %v1733_v56  ;;  %v727_v33 = vmul.f32 %v2049_v45, %v704_v26  ;;  %v798_v37 = vpack.c.bf16 %v784_v29, %v783_v24  ;;  %v749_v38 = vmul.f32 %v2054_v46, %v726_v20 }
 0x16a   : > { %1602 = vmatprep.mubr.bf16.mxu0 %v797_v23  ;;  %v2115_v39 = vadd.f32 %v2071_v57, %v748_v25  ;;  %v707_v40 = vsub.f32 %v684_v27, %v2045_v42  ;;  %v728_v43 = vmul.f32 %v2049_v45, %v705_v32  ;;  %v729_v47 = vmul.f32 %v2049_v45, %v706_v34 }
 0x16b   : > { %v750_v44 = vmul.f32 %v2054_v46, %v727_v33  ;;  %v708_v50 = vsub.f32 %v685_v35, %v2045_v42  ;;  %v709_v51 = vsub.f32 %v686_v36, %v2045_v42  ;;  %v799_v58 = vpack.c.bf16 %v786_v31, %v785_v30 }
 0x16c   : > { %1595 = vmatpush3.bf16.msra.mxu0 %v1733_v56  ;;  %1638 = vmatpush3.bf16.msra.mxu1 %v1733_v56  ;;  %v730_v49 = vmul.f32 %v2049_v45, %v707_v40  ;;  %v751_v53 = vmul.f32 %v2054_v46, %v728_v43  ;;  %v752_v55 = vmul.f32 %v2054_v46, %v729_v47  ;;  %v787_v19 = vmax.f32 %v2115_v39, 0.0 }
 0x16d   : > { %1596 = vmatprep.subr.bf16.mxu0 %v1734_v8  ;;  %1631 = vmatprep.subr.bf16.mxu1 %v1734_v8  ;;  %v773_v54 = vadd.f32 %v2071_v57, %v750_v44  ;;  %v710_v56 = vsub.f32 %v687_v41, %v2045_v42  ;;  %v731_v60 = vmul.f32 %v2049_v45, %v708_v50 }
 0x16e   : > { %v753_v59 = vmul.f32 %v2054_v46, %v730_v49  ;;  %v732_v61 = vmul.f32 %v2049_v45, %v709_v51  ;;  %v774_v62 = vadd.f32 %v2071_v57, %v751_v53  ;;  %v775_v0 = vadd.f32 %v2071_v57, %v752_v55 }
 0x16f   : > { %v789_v63 = vmax.f32 %v773_v54, 0.0  ;;  %v711_v1 = vsub.f32 %v688_v52, %v2045_v42  ;;  %v754_v3 = vmul.f32 %v2054_v46, %v731_v60  ;;  %v733_v7 = vmul.f32 %v2049_v45, %v710_v56 }
 0x170   : > { %1597 = vmatpush3.bf16.msra.mxu0 %v1734_v8  ;;  %1639 = vmatpush3.bf16.msra.mxu1 %v1734_v8  ;;  %v776_v2 = vadd.f32 %v2071_v57, %v753_v59  ;;  %v755_v4 = vmul.f32 %v2054_v46, %v732_v61  ;;  %v790_v5 = vmax.f32 %v774_v62, 0.0  ;;  %v791_v6 = vmax.f32 %v775_v0, 0.0 }
 0x171   : > { %1598 = vmatprep.subr.bf16.mxu0 %v1735_v28  ;;  %1632 = vmatprep.subr.bf16.mxu1 %v1735_v28  ;;  %v734_v8 = vmul.f32 %v2049_v45, %v711_v1  ;;  %v772_v9 = vadd.f32 %v2071_v57, %v749_v38  ;;  %v777_v11 = vadd.f32 %v2071_v57, %v754_v3 }
 0x172   : > { %v792_v10 = vmax.f32 %v776_v2, 0.0  ;;  %v778_v42 = vadd.f32 %v2071_v57, %v755_v4  ;;  %v801_v12 = vpack.c.bf16 %v790_v5, %v789_v63  ;;  %v756_v13 = vmul.f32 %v2054_v46, %v733_v7 }
 0x173   : > { %v757_v14 = vmul.f32 %v2054_v46, %v734_v8  ;;  %v793_v16 = vmax.f32 %v777_v11, 0.0  ;;  %v788_v20 = vmax.f32 %v772_v9, 0.0 }
 0x174   : > { %1599 = vmatpush3.bf16.msra.mxu0 %v1735_v28  ;;  %1640 = vmatpush3.bf16.msra.mxu1 %v1735_v28  ;;  %v802_v15 = vpack.c.bf16 %v792_v10, %v791_v6  ;;  %v794_v17 = vmax.f32 %v778_v42, 0.0  ;;  %v779_v45 = vadd.f32 %v2071_v57, %v756_v13 }
 0x175   : > { %1600 = vmatprep.subr.bf16.mxu0 %v1736_v48  ;;  %1633 = vmatprep.subr.bf16.mxu1 %v1736_v48  ;;  %v780_v18 = vadd.f32 %v2071_v57, %v757_v14  ;;  %v800_v46 = vpack.c.bf16 %v788_v20, %v787_v19 }
 0x176   : > { %1610 = vmatprep.mubr.bf16.mxu1 %v801_v12  ;;  %v803_v21 = vpack.c.bf16 %v794_v17, %v793_v16  ;;  %v795_v22 = vmax.f32 %v779_v45, 0.0 }
 0x177   : > { %v796_v23 = vmax.f32 %v780_v18, 0.0 }
 0x178   : > { %1601 = vmatpush3.bf16.msra.mxu0 %v1736_v48  ;;  %1641 = vmatpush3.bf16.msra.mxu1 %v1736_v48 }
 0x179   : > { %v804_v24 = vpack.c.bf16 %v796_v23, %v795_v22 }
 0x17b   : > { %1603 = vmatmul.mubr.bf16.vlgmr.msra.gmra.mxu0 %v798_v37  ;;  %1611 = vmatmul.mubr.bf16.vlgmr.msra.gmra.mxu1 %v802_v15 }
 0x17c   : > { %1606 = vmatprep.mubr.bf16.mxu0 %v799_v58  ;;  %1614 = vmatprep.mubr.bf16.mxu1 %v803_v21 }
 0x183   : > { %1607 = vmatmul.mubr.bf16.gmra.mxu0 %v800_v46  ;;  %1615 = vmatmul.mubr.bf16.gmra.mxu1 %v804_v24 }
 0x23b   : > { %v1604_v25 = vpop.f32.mrf.mxu0  ;;  %v1612_v26 = vpop.f32.mrf.mxu1 }
 0x23c   : > { %969 = vst [vmem:[%s2153_s22 + $0x10] sm:$0xff] %v1604_v25  ;;  %977 = vst [vmem:[%s2153_s22 + $0x50] sm:$0xff] %v1612_v26  ;;  %v1010_v37 = vmul.f32 %v1604_v25, %v1604_v25  ;;  %v1018_v7 = vmul.f32 %v1612_v26, %v1612_v26 }
 0x23d   : > { %v903_v57 = vpop.f32.mrf.mxu0  ;;  %v935_v27 = vpop.f32.mrf.mxu1 }
 0x23e   : > { %967 = vst [vmem:[%s2153_s22] sm:$0xff] %v903_v57  ;;  %975 = vst [vmem:[%s2153_s22 + $0x40] sm:$0xff] %v935_v27  ;;  %v1008_v32 = vmul.f32 %v903_v57, %v903_v57  ;;  %v1016_v1 = vmul.f32 %v935_v27, %v935_v27 }
 0x23f   : > { %v1605_v28 = vpop.f32.mrf.mxu0  ;;  %v1613_v29 = vpop.f32.mrf.mxu1 }
 0x240   : > { %970 = vst [vmem:[%s2153_s22 + $0x18] sm:$0xff] %v1605_v28  ;;  %978 = vst [vmem:[%s2153_s22 + $0x58] sm:$0xff] %v1613_v29  ;;  %v1011_v43 = vmul.f32 %v1605_v28, %v1605_v28  ;;  %v1019_v10 = vmul.f32 %v1613_v29, %v1613_v29 }
 0x241   : > { %v906_v30 = vpop.f32.mrf.mxu0  ;;  %v938_v31 = vpop.f32.mrf.mxu1 }
 0x242   : > { %968 = vst [vmem:[%s2153_s22 + $0x8] sm:$0xff] %v906_v30  ;;  %v984_v33 = vadd.f32 %v906_v30, %v903_v57  ;;  %v1009_v34 = vmul.f32 %v906_v30, %v906_v30  ;;  %976 = vst [vmem:[%s2153_s22 + $0x48] sm:$0xff] %v938_v31  ;;  %v1017_v5 = vmul.f32 %v938_v31, %v938_v31 }
 0x243   : > { %v1608_v35 = vpop.f32.mrf.mxu0  ;;  %v1616_v36 = vpop.f32.mrf.mxu1 }
 0x244   : > { %v985_v38 = vadd.f32 %v1604_v25, %v984_v33  ;;  %v1024_v39 = vadd.f32 %v1009_v34, %v1008_v32  ;;  %973 = vst [vmem:[%s2153_s22 + $0x30] sm:$0xff] %v1608_v35  ;;  %981 = vst [vmem:[%s2153_s22 + $0x70] sm:$0xff] %v1616_v36  ;;  %v1014_v59 = vmul.f32 %v1608_v35, %v1608_v35  ;;  %v1007_v34 = vld [vmem:[#allocation7] sm:$0x1] }
 0x245   : > { %v919_v40 = vpop.f32.mrf.mxu0  ;;  %v951_v41 = vpop.f32.mrf.mxu1  ;;  %v1022_v45 = vmul.f32 %v1616_v36, %v1616_v36 }
 0x246   : > { %v1025_v44 = vadd.f32 %v1024_v39, %v1010_v37  ;;  %971 = vst [vmem:[%s2153_s22 + $0x20] sm:$0xff] %v919_v40  ;;  %v986_v47 = vadd.f32 %v1605_v28, %v985_v38  ;;  %979 = vst [vmem:[%s2153_s22 + $0x60] sm:$0xff] %v951_v41  ;;  %v1012_v51 = vmul.f32 %v919_v40, %v919_v40 }
 0x247   : > { %v1609_v48 = vpop.f32.mrf.mxu0  ;;  %v1617_v49 = vpop.f32.mrf.mxu1  ;;  %v1020_v13 = vmul.f32 %v951_v41, %v951_v41 }
 0x248   : > { %v987_v50 = vadd.f32 %v986_v47, %v919_v40  ;;  %v1026_v52 = vadd.f32 %v1025_v44, %v1011_v43  ;;  %974 = vst [vmem:[%s2153_s22 + $0x38] sm:$0xff] %v1609_v48  ;;  %982 = vst [vmem:[%s2153_s22 + $0x78] sm:$0xff] %v1617_v49  ;;  %v1015_v62 = vmul.f32 %v1609_v48, %v1609_v48 }
 0x249   : > { %v922_v53 = vpop.f32.mrf.mxu0  ;;  %v954_v54 = vpop.f32.mrf.mxu1  ;;  %v1023_v20 = vmul.f32 %v1617_v49, %v1617_v49 }
 0x24a   : > { %v1027_v55 = vadd.f32 %v1026_v52, %v1012_v51  ;;  %972 = vst [vmem:[%s2153_s22 + $0x28] sm:$0xff] %v922_v53  ;;  %v988_v56 = vadd.f32 %v987_v50, %v922_v53  ;;  %v1013_v58 = vmul.f32 %v922_v53, %v922_v53  ;;  %980 = vst [vmem:[%s2153_s22 + $0x68] sm:$0xff] %v954_v54 }
 0x24b   : > { %v1021_v17 = vmul.f32 %v954_v54, %v954_v54 }
 0x24c   : > { %v989_v60 = vadd.f32 %v1608_v35, %v988_v56  ;;  %v1028_v61 = vadd.f32 %v1027_v55, %v1013_v58 }
 0x24e   : > { %v990_v63 = vadd.f32 %v1609_v48, %v989_v60  ;;  %v1029_v0 = vadd.f32 %v1028_v61, %v1014_v59 }
 0x250   : > { %v1030_v2 = vadd.f32 %v1029_v0, %v1015_v62  ;;  %v991_v3 = vadd.f32 %v990_v63, %v935_v27 }
 0x252   : > { %v992_v4 = vadd.f32 %v991_v3, %v938_v31  ;;  %v1031_v6 = vadd.f32 %v1030_v2, %v1016_v1  ;;  %v983_v31 = vld [vmem:[#allocation6] sm:$0x1] }
 0x254   : > { %v993_v8 = vadd.f32 %v1612_v26, %v992_v4  ;;  %v1032_v9 = vadd.f32 %v1031_v6, %v1017_v5 }
 0x256   : > { %v1033_v11 = vadd.f32 %v1032_v9, %v1018_v7  ;;  %v994_v42 = vadd.f32 %v1613_v29, %v993_v8 }
 0x258   : > { %v995_v12 = vadd.f32 %v994_v42, %v951_v41  ;;  %v1034_v14 = vadd.f32 %v1033_v11, %v1019_v10 }
 0x25a   : > { %v1035_v15 = vadd.f32 %v1034_v14, %v1020_v13  ;;  %v996_v16 = vadd.f32 %v995_v12, %v954_v54 }
 0x25c   : > { %v997_v18 = vadd.f32 %v1616_v36, %v996_v16  ;;  %v1036_v19 = vadd.f32 %v1035_v15, %v1021_v17 }
 0x25e   : > { %v998_v21 = vadd.f32 %v1617_v49, %v997_v18  ;;  %v1037_v22 = vadd.f32 %v1036_v19, %v1022_v45 }
 0x260   : > { %v999_v23 = vrot.slane %v998_v21, 4  ;;  %v1038_v46 = vadd.f32 %v1037_v22, %v1023_v20 }
 0x262   : > { %v1000_v24 = vadd.f32 %v999_v23, %v998_v21  ;;  %v1039_v25 = vrot.slane %v1038_v46, 4 }
 0x264   : > { %v1001_v26 = vrot.slane %v1000_v24, 2  ;;  %v1040_v57 = vadd.f32 %v1039_v25, %v1038_v46 }
 0x266   : > { %v1002_v27 = vadd.f32 %v1001_v26, %v1000_v24  ;;  %v1041_v28 = vrot.slane %v1040_v57, 2 }
 0x268   : > { %v1003_v29 = vrot.slane %v1002_v27, 1  ;;  %v1042_v30 = vadd.f32 %v1041_v28, %v1040_v57 }
 0x26a   : > { %v1004_v32 = vadd.f32 %v1003_v29, %v1002_v27  ;;  %v1043_v33 = vrot.slane %v1042_v30, 1 }
 0x26c   : > { %v1005_v35 = vadd.f32 %v1004_v32, %v983_v31  ;;  %v1044_v36 = vadd.f32 %v1043_v33, %v1042_v30  ;;  %1050 = sbr.rel (%p1524_p5) target bundleno = 653 (0x28d), region = 80 }
 0x26e   : > { %1006 = vst [vmem:[#allocation6] sm:$0x1] %v1005_v35  ;;  %v1045_v37 = vadd.f32 %v1044_v36, %v1007_v34 }
 0x270   : > { %1046 = vst [vmem:[#allocation7] sm:$0x1] %v1045_v37 }
 0x275   : > { %v1051_v38 = vld [vmem:[#allocation6] sm:$0x1] }
 0x276   : > { %v1052_v40 = vmul.f32 0.001953125, %v1051_v38 }
 0x277   : > { %v1053_v39 = vld [vmem:[#allocation7] sm:$0x1] }
 0x278   : > { %v1054_v41 = vmul.f32 0.001953125, %v1053_v39  ;;  %v1055_v43 = vmul.f32 %v1052_v40, %v1052_v40  ;;  %1057 = vst [vmem:[#allocation6] sm:$0x1] %v1052_v40 }
 0x27a   : > { %v1056_v44 = vsub.f32 %v1054_v41, %v1055_v43 }
 0x27c   : > { %v1058_v47 = vadd.f32 1e-05, %v1056_v44 }
 0x27e   : > { %1737 = vrsqrt.f32 %v1058_v47 }
 0x28b   : > { %v1738_v48 = vpop.eup %1737 }
 0x28c   : > { %1060 = vst [vmem:[#allocation7] sm:$0x1] %v1738_v48 }
 0x28d PF: > { %p1525_p6 = scmp.ne.s32.totalorder %s1819_s15, 2 }
 0x28e   : > { %s2176_s14 = scalar_lea.vmem (!%p1525_p6), [#allocation3], %s1964_s29  ;;  %s1245_s8 = sld [smem:[#allocation8]] (!%p1525_p6) }
 0x28f   : > { %1064 = sbr.rel (%p1525_p6) target bundleno = 847 (0x34f), region = 84 }
 0x294   : > { %v2173_v49 = vld [vmem:[#allocation6] ss:$0 sm:$0xff]  ;;  %v2179_v51 = vld [vmem:[#allocation7] ss:$0 sm:$0xff]  ;;  %v2185_v53 = vld [vmem:[%s2399_s5] ss:$0 sm:$0xff] }
 0x295   : > { %v1066_v50 = vld [vmem:[%s2176_s14] sm:$0xff]  ;;  %v1068_v54 = vld [vmem:[%s2176_s14 + $0x10] sm:$0xff]  ;;  %v1067_v55 = vld [vmem:[%s2176_s14 + $0x8] sm:$0xff]  ;;  %vm1290_vm1 = vcmask 130112   ;;  %vm1297_vm2 = vcmask 195712   ;;  %vm1304_vm3 = vcmask 261312  }
 0x296   : > { %v1089_v52 = vsub.f32 %v1066_v50, %v2173_v49  ;;  %v1091_v56 = vsub.f32 %v1068_v54, %v2173_v49  ;;  %v1090_v58 = vsub.f32 %v1067_v55, %v2173_v49  ;;  %v1069_v59 = vld [vmem:[%s2176_s14 + $0x18] sm:$0xff]  ;;  %v1070_v60 = vld [vmem:[%s2176_s14 + $0x20] sm:$0xff]  ;;  %v1071_v61 = vld [vmem:[%s2176_s14 + $0x28] sm:$0xff]  ;;  %vm1311_vm4 = vcmask 326912  }
 0x297   : > { %v1092_v63 = vsub.f32 %v1069_v59, %v2173_v49  ;;  %v1093_v0 = vsub.f32 %v1070_v60, %v2173_v49  ;;  %v1094_v1 = vsub.f32 %v1071_v61, %v2173_v49  ;;  %v1072_v2 = vld [vmem:[%s2176_s14 + $0x30] sm:$0xff]  ;;  %v1073_v3 = vld [vmem:[%s2176_s14 + $0x38] sm:$0xff]  ;;  %v2203_v4 = vld [vmem:[%s2400_s6] ss:$0 sm:$0xff]  ;;  %vm1318_vm5 = vcmask 392512  }
 0x298   : > { %v1112_v62 = vmul.f32 %v2179_v51, %v1089_v52  ;;  %v1114_v5 = vmul.f32 %v2179_v51, %v1091_v56  ;;  %v1113_v6 = vmul.f32 %v2179_v51, %v1090_v58  ;;  %v1095_v7 = vsub.f32 %v1072_v2, %v2173_v49  ;;  %v2224_v19 = vld [vmem:[%s2401_s7] ss:$0 sm:$0xff]  ;;  %v1075_v33 = vld [vmem:[%s2176_s14 + $0x48] sm:$0xff]  ;;  %v1076_v34 = vld [vmem:[%s2176_s14 + $0x50] sm:$0xff] }
 0x299   : > { %v1096_v8 = vsub.f32 %v1073_v3, %v2173_v49  ;;  %v1115_v10 = vmul.f32 %v2179_v51, %v1092_v63  ;;  %v1116_v11 = vmul.f32 %v2179_v51, %v1093_v0  ;;  %v1117_v42 = vmul.f32 %v2179_v51, %v1094_v1  ;;  %v1074_v30 = vld [vmem:[%s2176_s14 + $0x40] sm:$0xff]  ;;  %v1077_v38 = vld [vmem:[%s2176_s14 + $0x58] sm:$0xff]  ;;  %v1079_v40 = vld [vmem:[%s2176_s14 + $0x68] sm:$0xff] }
 0x29a   : > { %v1135_v9 = vmul.f32 %v2185_v53, %v1112_v62  ;;  %v1137_v12 = vmul.f32 %v2185_v53, %v1114_v5  ;;  %v1136_v13 = vmul.f32 %v2185_v53, %v1113_v6  ;;  %v1118_v14 = vmul.f32 %v2179_v51, %v1095_v7  ;;  %v1078_v39 = vld [vmem:[%s2176_s14 + $0x60] sm:$0xff]  ;;  %v1080_v54 = vld [vmem:[%s2176_s14 + $0x70] sm:$0xff]  ;;  %v1081_v60 = vld [vmem:[%s2176_s14 + $0x78] sm:$0xff] }
 0x29b   : > { %v1119_v15 = vmul.f32 %v2179_v51, %v1096_v8  ;;  %v1138_v17 = vmul.f32 %v2185_v53, %v1115_v10  ;;  %v1139_v45 = vmul.f32 %v2185_v53, %v1116_v11  ;;  %v1140_v18 = vmul.f32 %v2185_v53, %v1117_v42 }
 0x29c   : > { %v1158_v16 = vadd.f32 %v2203_v4, %v1135_v9  ;;  %v1160_v20 = vadd.f32 %v2203_v4, %v1137_v12  ;;  %v1159_v21 = vadd.f32 %v2203_v4, %v1136_v13  ;;  %v1141_v22 = vmul.f32 %v2185_v53, %v1118_v14 }
 0x29d   : > { %v1142_v23 = vmul.f32 %v2185_v53, %v1119_v15  ;;  %v1161_v24 = vadd.f32 %v2203_v4, %v1138_v17  ;;  %v1162_v25 = vadd.f32 %v2203_v4, %v1139_v45  ;;  %v1163_v26 = vadd.f32 %v2203_v4, %v1140_v18 }
 0x29e   : > { %v1174_v46 = vmax.f32 %v1158_v16, 0.0  ;;  %v1176_v57 = vmax.f32 %v1160_v20, 0.0  ;;  %v1175_v27 = vmax.f32 %v1159_v21, 0.0  ;;  %v1164_v28 = vadd.f32 %v2203_v4, %v1141_v22 }
 0x29f   : > { %v1165_v29 = vadd.f32 %v2203_v4, %v1142_v23  ;;  %v1177_v32 = vmax.f32 %v1161_v24, 0.0  ;;  %v1178_v36 = vmax.f32 %v1162_v25, 0.0  ;;  %v1179_v37 = vmax.f32 %v1163_v26, 0.0 }
 0x2a0   : > { %v1197_v31 = vmul.f32 %v2224_v19, %v1174_v46  ;;  %v1199_v35 = vmul.f32 %v2224_v19, %v1176_v57  ;;  %v1198_v41 = vmul.f32 %v2224_v19, %v1175_v27  ;;  %v1180_v43 = vmax.f32 %v1164_v28, 0.0 }
 0x2a1   : > { %v1097_v44 = vsub.f32 %v1074_v30, %v2173_v49  ;;  %v1200_v47 = vmul.f32 %v2224_v19, %v1177_v32  ;;  %v1181_v48 = vmax.f32 %v1165_v29, 0.0  ;;  %v1098_v50 = vsub.f32 %v1075_v33, %v2173_v49 }
 0x2a2   : > { %1213 = vadd.xlane.f32.xlu0 %v1197_v31  ;;  %1217 = vadd.xlane.f32.xlu1 %v1199_v35  ;;  %v1099_v52 = vsub.f32 %v1076_v34, %v2173_v49  ;;  %v1100_v56 = vsub.f32 %v1077_v38, %v2173_v49  ;;  %v1101_v58 = vsub.f32 %v1078_v39, %v2173_v49  ;;  %vm1325_vm6 = vcmask 458112  }
 0x2a3   : > { %v1120_v55 = vmul.f32 %v2179_v51, %v1097_v44  ;;  %v1102_v59 = vsub.f32 %v1079_v40, %v2173_v49  ;;  %v1201_v61 = vmul.f32 %v2224_v19, %v1178_v36  ;;  %v1202_v62 = vmul.f32 %v2224_v19, %v1179_v37 }
 0x2a4   : > { %v1121_v63 = vmul.f32 %v2179_v51, %v1098_v50  ;;  %v1122_v0 = vmul.f32 %v2179_v51, %v1099_v52  ;;  %v1123_v2 = vmul.f32 %v2179_v51, %v1100_v56  ;;  %v1124_v3 = vmul.f32 %v2179_v51, %v1101_v58 }
 0x2a5   : > { %v1143_v1 = vmul.f32 %v2185_v53, %v1120_v55  ;;  %v1103_v5 = vsub.f32 %v1080_v54, %v2173_v49  ;;  %v1125_v8 = vmul.f32 %v2179_v51, %v1102_v59  ;;  %v1104_v9 = vsub.f32 %v1081_v60, %v2173_v49 }
 0x2a6   : > { %1215 = vadd.xlane.f32.xlu0 %v1198_v41  ;;  %1219 = vadd.xlane.f32.xlu1 %v1200_v47  ;;  %v1144_v6 = vmul.f32 %v2185_v53, %v1121_v63  ;;  %v1145_v7 = vmul.f32 %v2185_v53, %v1122_v0  ;;  %v1146_v11 = vmul.f32 %v2185_v53, %v1123_v2  ;;  %v1279_v37 = vlaneseq }
 0x2a7   : > { %v1166_v10 = vadd.f32 %v2203_v4, %v1143_v1  ;;  %v1203_v42 = vmul.f32 %v2224_v19, %v1180_v43  ;;  %v1204_v12 = vmul.f32 %v2224_v19, %v1181_v48  ;;  %v1147_v16 = vmul.f32 %v2185_v53, %v1124_v3 }
 0x2a8   : > { %v1167_v13 = vadd.f32 %v2203_v4, %v1144_v6  ;;  %v1168_v15 = vadd.f32 %v2203_v4, %v1145_v7  ;;  %v1126_v17 = vmul.f32 %v2179_v51, %v1103_v5  ;;  %v1169_v45 = vadd.f32 %v2203_v4, %v1146_v11 }
 0x2a9   : > { %v1182_v14 = vmax.f32 %v1166_v10, 0.0  ;;  %v1148_v18 = vmul.f32 %v2185_v53, %v1125_v8  ;;  %v1127_v20 = vmul.f32 %v2179_v51, %v1104_v9  ;;  %v1170_v23 = vadd.f32 %v2203_v4, %v1147_v16 }
 0x2aa   : > { %1221 = vadd.xlane.f32.xlu0 %v1201_v61  ;;  %1223 = vadd.xlane.f32.xlu1 %v1202_v62  ;;  %v1183_v49 = vmax.f32 %v1167_v13, 0.0  ;;  %v1184_v22 = vmax.f32 %v1168_v15, 0.0  ;;  %v1149_v46 = vmul.f32 %v2185_v53, %v1126_v17  ;;  %v1185_v25 = vmax.f32 %v1169_v45, 0.0 }
 0x2ab   : > { %v1205_v21 = vmul.f32 %v2224_v19, %v1182_v14  ;;  %v1171_v26 = vadd.f32 %v2203_v4, %v1148_v18  ;;  %v1150_v57 = vmul.f32 %v2185_v53, %v1127_v20  ;;  %v1186_v51 = vmax.f32 %v1170_v23, 0.0 }
 0x2ac   : > { %v1206_v24 = vmul.f32 %v2224_v19, %v1183_v49  ;;  %v1207_v27 = vmul.f32 %v2224_v19, %v1184_v22  ;;  %v1172_v28 = vadd.f32 %v2203_v4, %v1149_v46  ;;  %v1208_v29 = vmul.f32 %v2224_v19, %v1185_v25 }
 0x2ad   : > { %v1187_v30 = vmax.f32 %v1171_v26, 0.0  ;;  %v1173_v31 = vadd.f32 %v2203_v4, %v1150_v57  ;;  %v1209_v32 = vmul.f32 %v2224_v19, %v1186_v51  ;;  %v2291_v38 = vand.u32 127, %v1279_v37 }
 0x2ae   : > { %1225 = vadd.xlane.f32.xlu0 %v1203_v42  ;;  %1227 = vadd.xlane.f32.xlu1 %v1204_v12  ;;  %v1188_v33 = vmax.f32 %v1172_v28, 0.0  ;;  %v2293_v4 = vshrl.u32 %v1279_v37, 7  ;;  %v2296_v40 = vstv %s1245_s8  ;;  %vm1332_vm7 = vcmask 523712  }
 0x2af   : > { %v1210_v34 = vmul.f32 %v2224_v19, %v1187_v30  ;;  %v1189_v53 = vmax.f32 %v1173_v31, 0.0  ;;  %v1285_v39 = vadd.s32 4294967288, %v2291_v38  ;;  %v1292_v43 = vadd.s32 4294967280, %v2291_v38 }
 0x2b0   : > { %v1211_v35 = vmul.f32 %v2224_v19, %v1188_v33  ;;  %v1299_v44 = vadd.s32 4294967272, %v2291_v38  ;;  %v1306_v52 = vadd.s32 4294967264, %v2291_v38  ;;  %v1313_v59 = vadd.s32 4294967256, %v2291_v38 }
 0x2b1   : > { %v1212_v36 = vmul.f32 %v2224_v19, %v1189_v53  ;;  %v1283_v19 = vsub.s32 %v2291_v38, %v2293_v4  ;;  %v1288_v50 = vsub.s32 %v1285_v39, %v2293_v4  ;;  %v1295_v54 = vsub.s32 %v1292_v43, %v2293_v4 }
 0x2b2   : > { %1229 = vadd.xlane.f32.xlu0 %v1205_v21  ;;  %1231 = vadd.xlane.f32.xlu1 %v1206_v24  ;;  %v1302_v58 = vsub.s32 %v1299_v44, %v2293_v4  ;;  %v1309_v1 = vsub.s32 %v1306_v52, %v2293_v4  ;;  %v1320_v2 = vadd.s32 4294967248, %v2291_v38  ;;  %v1316_v7 = vsub.s32 %v1313_v59, %v2293_v4 }
 0x2b3   : > { %v1327_v8 = vadd.s32 4294967240, %v2291_v38  ;;  %v1334_v16 = vadd.s32 4294967232, %v2291_v38  ;;  %v1341_v18 = vadd.s32 4294967224, %v2291_v38  ;;  %v1348_v25 = vadd.s32 4294967216, %v2291_v38 }
 0x2b4   : > { %v1323_v15 = vsub.s32 %v1320_v2, %v2293_v4  ;;  %v1355_v28 = vadd.s32 4294967208, %v2291_v38  ;;  %vm1339_vm8 = vcmask 589312   ;;  %v1362_v53 = vadd.s32 4294967200, %v2291_v38 }
 0x2b5   : > { %v1330_v45 = vsub.s32 %v1327_v8, %v2293_v4  ;;  %v1337_v24 = vsub.s32 %v1334_v16, %v2293_v4  ;;  %v1344_v51 = vsub.s32 %v1341_v18, %v2293_v4  ;;  %vm1346_vm9 = vcmask 654912  }
 0x2b6   : > { %1233 = vadd.xlane.f32.xlu0 %v1207_v27  ;;  %1235 = vadd.xlane.f32.xlu1 %v1208_v29  ;;  %v1358_v39 = vsub.s32 %v1355_v28, %v2293_v4  ;;  %vm1353_vm10 = vcmask 720512   ;;  %v1376_v52 = vadd.s32 4294967184, %v2291_v38  ;;  %v1383_v59 = vadd.s32 4294967176, %v2291_v38 }
 0x2b7   : > { %vm1360_vm11 = vcmask 786112   ;;  %vm1367_vm12 = vcmask 851712   ;;  %vm1374_vm13 = vcmask 917312   ;;  %vm1381_vm14 = vcmask 982912  }
 0x2b8   : > { %vm1388_vm15 = vcmask 1048512  }
 0x2ba   : > { %1237 = vadd.xlane.f32.xlu0 %v1209_v32  ;;  %1239 = vadd.xlane.f32.xlu1 %v1210_v34  ;;  %v1351_v34 = vsub.s32 %v1348_v25, %v2293_v4 }
 0x2be   : > { %1241 = vadd.xlane.f32.xlu0 %v1211_v35  ;;  %1243 = vadd.xlane.f32.xlu1 %v1212_v36 }
 0x32b   : > { %v1214_v41 = vpop.xlane.xlu0 %1213  ;;  %v1218_v47 = vpop.xlane.xlu1 %1217 }
 0x32c   : > { %v1247_v48 = vadd.f32 %v2296_v40, %v1214_v41  ;;  %v1249_v55 = vadd.f32 %v2296_v40, %v1218_v47  ;;  %v1369_v41 = vadd.s32 4294967192, %v2291_v38 }
 0x32e   : > { %v1284_v63 = vrot.slane %v1247_v48, %v1283_v19  ;;  %v1296_v3 = vrot.slane %v1249_v55, %v1295_v54 }
 0x32f   : > { %v1216_v56 = vpop.xlane.xlu0 %1215  ;;  %v1220_v61 = vpop.xlane.xlu1 %1219 }
 0x330   : > { %v1248_v60 = vadd.f32 %v2296_v40, %v1216_v56  ;;  %v1250_v62 = vadd.f32 %v2296_v40, %v1220_v61 }
 0x332   : > { %v1289_v0 = vrot.slane %v1248_v60, %v1288_v50  ;;  %v1303_v5 = vrot.slane %v1250_v62, %v1302_v58  ;;  %v1365_v50 = vsub.s32 %v1362_v53, %v2293_v4  ;;  %v1372_v58 = vsub.s32 %v1369_v41, %v2293_v4 }
 0x333   : > { %v1222_v6 = vpop.xlane.xlu0 %1221  ;;  %v1224_v11 = vpop.xlane.xlu1 %1223 }
 0x334   : > { %v1291_v9 = vsel %vm1290_vm1, %v1289_v0, %v1284_v63  ;;  %v1251_v10 = vadd.f32 %v2296_v40, %v1222_v6  ;;  %v1252_v12 = vadd.f32 %v2296_v40, %v1224_v11  ;;  %v1386_v6 = vsub.s32 %v1383_v59, %v2293_v4 }
 0x335   : > { %v1298_v42 = vsel %vm1297_vm2, %v1296_v3, %v1291_v9 }
 0x336   : > { %v1305_v13 = vsel %vm1304_vm3, %v1303_v5, %v1298_v42  ;;  %v1310_v14 = vrot.slane %v1251_v10, %v1309_v1  ;;  %v1317_v17 = vrot.slane %v1252_v12, %v1316_v7  ;;  %v1379_v1 = vsub.s32 %v1376_v52, %v2293_v4 }
 0x337   : > { %v1226_v49 = vpop.xlane.xlu0 %1225  ;;  %v1228_v22 = vpop.xlane.xlu1 %1227 }
 0x338   : > { %v1312_v20 = vsel %vm1311_vm4, %v1310_v14, %v1305_v13  ;;  %v1253_v21 = vadd.f32 %v2296_v40, %v1226_v49  ;;  %v1254_v23 = vadd.f32 %v2296_v40, %v1228_v22 }
 0x339   : > { %v1319_v26 = vsel %vm1318_vm5, %v1317_v17, %v1312_v20 }
 0x33a   : > { %v1324_v46 = vrot.slane %v1253_v21, %v1323_v15  ;;  %v1331_v57 = vrot.slane %v1254_v23, %v1330_v45 }
 0x33b   : > { %v1230_v27 = vpop.xlane.xlu0 %1229  ;;  %v1232_v31 = vpop.xlane.xlu1 %1231 }
 0x33c   : > { %v1326_v29 = vsel %vm1325_vm6, %v1324_v46, %v1319_v26  ;;  %v1255_v30 = vadd.f32 %v2296_v40, %v1230_v27  ;;  %v1256_v32 = vadd.f32 %v2296_v40, %v1232_v31 }
 0x33d   : > { %v1333_v35 = vsel %vm1332_vm7, %v1331_v57, %v1326_v29 }
 0x33e   : > { %v1338_v33 = vrot.slane %v1255_v30, %v1337_v24  ;;  %v1345_v36 = vrot.slane %v1256_v32, %v1344_v51 }
 0x33f   : > { %v1234_v37 = vpop.xlane.xlu0 %1233  ;;  %v1236_v47 = vpop.xlane.xlu1 %1235 }
 0x340   : > { %v1340_v43 = vsel %vm1339_vm8, %v1338_v33, %v1333_v35  ;;  %v1257_v44 = vadd.f32 %v2296_v40, %v1234_v37  ;;  %v1258_v19 = vadd.f32 %v2296_v40, %v1236_v47 }
 0x341   : > { %v1347_v54 = vsel %vm1346_vm9, %v1345_v36, %v1340_v43 }
 0x342   : > { %v1352_v48 = vrot.slane %v1257_v44, %v1351_v34  ;;  %v1359_v55 = vrot.slane %v1258_v19, %v1358_v39 }
 0x343   : > { %v1238_v56 = vpop.xlane.xlu0 %1237  ;;  %v1240_v62 = vpop.xlane.xlu1 %1239 }
 0x344   : > { %v1354_v60 = vsel %vm1353_vm10, %v1352_v48, %v1347_v54  ;;  %v1259_v61 = vadd.f32 %v2296_v40, %v1238_v56  ;;  %v1260_v63 = vadd.f32 %v2296_v40, %v1240_v62 }
 0x345   : > { %v1361_v2 = vsel %vm1360_vm11, %v1359_v55, %v1354_v60 }
 0x346   : > { %v1366_v0 = vrot.slane %v1259_v61, %v1365_v50  ;;  %v1373_v3 = vrot.slane %v1260_v63, %v1372_v58 }
 0x347   : > { %v1242_v5 = vpop.xlane.xlu0 %1241  ;;  %v1244_v8 = vpop.xlane.xlu1 %1243 }
 0x348   : > { %v1368_v7 = vsel %vm1367_vm12, %v1366_v0, %v1361_v2  ;;  %v1261_v38 = vadd.f32 %v2296_v40, %v1242_v5  ;;  %v1262_v9 = vadd.f32 %v2296_v40, %v1244_v8 }
 0x349   : > { %v1375_v11 = vsel %vm1374_vm13, %v1373_v3, %v1368_v7 }
 0x34a   : > { %v1380_v10 = vrot.slane %v1261_v38, %v1379_v1  ;;  %v1387_v42 = vrot.slane %v1262_v9, %v1386_v6 }
 0x34c   : > { %v1382_v12 = vsel %vm1381_vm14, %v1380_v10, %v1375_v11 }
 0x34d   : > { %v1389_v13 = vsel %vm1388_vm15, %v1387_v42, %v1382_v12 }
 0x34e   : > { %1391 = vst [vmem:[%s1974_s23] sm:$0x1] %v1389_v13 }
 0x34f PF: > { %s1403_s22 = scalar_lea.hbm %s2403_s9, %s1960_s28  ;;  %s1405_s14 = sshll.u32 %s1974_s23, 4  ;;  %s1406_s14 = int_to_ptr.vmem [resolvable:$true] %s1405_s14 }
 0x350   : > { %s2410_s15 = sand.u32 1, %s1807_s12   ;;  %s1739_s29 = scalar_lea.vmem %s1406_s14, 16 }
 0x351   : > { %s1393_s30 = scalar_lea.sflag [#allocation10], %s2410_s15  ;;  %p1740_p7 = scmp.ne.s32.totalorder %s1406_s14, %s1739_s29 }
 0x352   : > { %s1835_s27 = smov [#allocation9]  }
 0x353   : > { %p1741_p9 = pnand %p1740_p7, %p1941_p3  ;;  %s1743_s0 = sshll.u32 %s1835_s27, 4  ;;  %s1744_s0 = int_to_ptr.vmem [resolvable:$false] %s1743_s0 }
 0x354   : > { %s1745_s10 = scalar_lea.vmem %s1744_s0, 32  ;;  %p1746_p11 = scmp.lt.s32.totalorder %s1406_s14, %s1744_s0 }
 0x355   : > { %p1742_p10 = pneg %p1741_p9  ;;  %p1747_p12 = scmp.lt.s32.totalorder %s1745_s10, %s1739_s29 }
 0x357   : > { %p1748_p13 = por %p1747_p12, %p1746_p11 }
 0x359   : > { %p1749_p0 = pnand %p1748_p13, %p1742_p10 }
 0x35b   : > { %1752 = shalt.err (!%p1749_p0)
}
 0x35c   : > { %s1753_s8 = scalar_lea.hbm %s1403_s22, 16  ;;  %s1757_s19 = scalar_lea.hbm %s2403_s9, 64 }
 0x35d   : > { %p1754_p1 = scmp.ne.s32.totalorder %s1403_s22, %s1753_s8  ;;  %p1758_p5 = scmp.lt.s32.totalorder %s1403_s22, %s2403_s9 }
 0x35e   : > { %p1759_p6 = scmp.lt.s32.totalorder %s1757_s19, %s1753_s8 }
 0x35f   : > { %p1755_p2 = pnand %p1754_p1, %p1941_p3 }
 0x360   : > { %p1760_p7 = por %p1759_p6, %p1758_p5 }
 0x361   : > { %p1756_p4 = pneg %p1755_p2 }
 0x363   : > { %p1761_p9 = pnand %p1760_p7, %p1756_p4 }
 0x365   : > { %1764 = shalt.err (!%p1761_p9)
}
 0x366   : > { %1642 = dma.vmem_to_hbm [thread:$0]  (%p1941_p3), %s1406_s14, 16, %s1403_s22, %s1393_s30  }
 0x367 PF: > { %p1648_p10 = scmp.ge.s32.totalorder %s1831_s18, 2  ;;  %s1417_s29 = sand.u32 1, %s1803_s11  }
 0x368   : > { %s1418_s27 = scalar_lea.sflag [#allocation10], %s1417_s29 }
 0x369   : > { %p1645_p11 = pnand %p1648_p10, %p1952_p8 }
 0x36b   : > { %p1646_p12 = pneg %p1645_p11 }
 0x36d   : > { %1798 = dma.done.wait (%p1646_p12), %s1418_s27, 16  }
 0x36e   : > { %1800 = vsyncadd (%p1646_p12), %s1418_s27, 4294967280  ;;  %s23_s18 = sadd.s32 1, %s1831_s18   ;;  %s2411_s24 = sld [smem:[#allocation12_spill]] }
 0x36f   : > { %p20_p13 = scmp.ge.s32.totalorder %s23_s18, 14   ;;  %s2412_s11 = smov %s1807_s12 }
 0x370   : > { %s2413_s12 = smov %s1811_s13  ;;  %s2414_s13 = smov %s1950_s25 }
 0x371   : > { %s2415_s14 = smov %s1823_s16  ;;  %s2416_s15 = smov %s1827_s17 }
 0x372   : > { %s2417_s16 = smov %s2420_s20  ;;  %22 = sbr.rel (!%p20_p13) target bundleno = 8 (0x8), region = 123 }
 0x374   : > { %s2418_s17 = smov %s2411_s24 }
 0x377   :  { %1422 = vsyncpa [#allocation10], 1 }
 0x378   :  { %1424 = vsyncpa [#allocation10 + $0x1], 1 }

</bundles_post_ra>
